<compile_context>
chip_gen: v7x
topology: tpu7x:2x2x1
jax: 0.10.0
libtpu: 0.0.40
codegen_flags: <defaults>
</compile_context>

<pallas_src>
import math
import numpy as np
import jax
import jax.numpy as jnp
from jax import lax
from jax.experimental import pallas as pl
from jax.experimental.pallas import tpu as pltpu

SHIFT_PIXEL = 1
CHANNEL_GAMMA = 0.25
MIN_EXP = -1e38                      # same role as MIN_VALUE in the CUDA kernel


# --------------------------------------------------------------------------
# Generation-aware budgets / tiling
# --------------------------------------------------------------------------

def _tpu_vmem_capacity_bytes():
    try:
        fn = getattr(pltpu, "get_tpu_info", None)
        if fn is not None:
            cap = getattr(fn(), "vmem_capacity_bytes", None)
            if cap:
                return int(cap)
    except Exception:
        pass
    return 64 * 1024 * 1024          # conservative default (v7x per-core VMEM)


_VMEM_CAPACITY = _tpu_vmem_capacity_bytes()
# v5e/v6e have 128 MiB physical VMEM -> generous scoped budget.
# v7x has 64 MiB per TensorCore -> keep the budget tight.
_VMEM_BUDGET = (80 * 1024 * 1024 if _VMEM_CAPACITY >= 100 * 1024 * 1024
                else 40 * 1024 * 1024)


def _pick_tile_m(M, bytes_per_row):
    """Largest nice divisor of M whose (double-buffered) row working set fits
    roughly a third of the VMEM budget (weights/accumulators use the rest)."""
    cap_rows = max(8, (_VMEM_BUDGET // 3) // max(int(bytes_per_row), 1))
    for t in (1024, 512, 256, 128, 64, 32, 16, 8):
        if t <= cap_rows and M % t == 0:
            return t
    return M


def _pick_tile_h(H):
    for t in (512, 256, 128):
        if H % t == 0:
            return t
    return H


def _pick_tile_c(C):
    return 128 if C % 128 == 0 else C


def _mparams(semantics):
    return pltpu.CompilerParams(dimension_semantics=semantics,
                                vmem_limit_bytes=_VMEM_BUDGET)


# --------------------------------------------------------------------------
# Pallas kernels
# --------------------------------------------------------------------------

def _layernorm_kernel(x_ref, g_ref, b_ref, o_ref):
    x = x_ref[...]
    mean = jnp.mean(x, axis=-1, keepdims=True)
    xc = x - mean
    var = jnp.mean(xc * xc, axis=-1, keepdims=True)
    inv = lax.rsqrt(var + 1e-5)
    o_ref[...] = (xc * inv * g_ref[...] + b_ref[...]).astype(o_ref.dtype)


def _spatial_mixproj_kernel(x_ref, xx_ref, mk_ref, mv_ref, mr_ref,
                            wk_ref, wv_ref, wr_ref,
                            k_ref, v_ref, sr_ref):
    x = x_ref[...].astype(jnp.float32)
    xx = xx_ref[...].astype(jnp.float32)
    mk = mk_ref[...]
    mv = mv_ref[...]
    mr = mr_ref[...]
    xk = (x * mk + xx * (1.0 - mk)).astype(jnp.bfloat16)
    xv = (x * mv + xx * (1.0 - mv)).astype(jnp.bfloat16)
    xr = (x * mr + xx * (1.0 - mr)).astype(jnp.bfloat16)
    k_ref[...] = jnp.dot(xk, wk_ref[...],
                         preferred_element_type=jnp.float32).astype(k_ref.dtype)
    v_ref[...] = jnp.dot(xv, wv_ref[...],
                         preferred_element_type=jnp.float32).astype(v_ref.dtype)
    r = jnp.dot(xr, wr_ref[...], preferred_element_type=jnp.float32)
    sr_ref[...] = jax.nn.sigmoid(r).astype(sr_ref.dtype)


def _channel_mix_kernel(x_ref, xx_ref, res_ref, mk_ref, mr_ref,
                        wkey_ref, wval_ref, wrec_ref, o_ref, acc_ref, xk_ref):
    h = pl.program_id(1)

    @pl.when(h == 0)
    def _():
        # Hoisted: token mix + bf16 cast computed once per M-tile, reused for
        # every HID tile of the K-reduction.
        x = x_ref[...].astype(jnp.float32)
        xx = xx_ref[...].astype(jnp.float32)
        mk = mk_ref[...]
        xk_ref[...] = (x * mk + xx * (1.0 - mk)).astype(jnp.bfloat16)
        acc_ref[...] = jnp.zeros_like(acc_ref)

    k = jnp.dot(xk_ref[...], wkey_ref[...], preferred_element_type=jnp.float32)
    k = jnp.square(jnp.maximum(k, 0.0)).astype(jnp.bfloat16)
    acc_ref[...] += jnp.dot(k, wval_ref[...], preferred_element_type=jnp.float32)

    @pl.when(h == pl.num_programs(1) - 1)
    def _():
        x = x_ref[...].astype(jnp.float32)
        xx = xx_ref[...].astype(jnp.float32)
        mr = mr_ref[...]
        xr = (x * mr + xx * (1.0 - mr)).astype(jnp.bfloat16)
        r = jnp.dot(xr, wrec_ref[...], preferred_element_type=jnp.float32)
        # fused residual add
        o_ref[...] = res_ref[...] + jax.nn.sigmoid(r) * acc_ref[...]


def _combine_out_kernel(sr_ref, rw_ref, srh_ref, rwh_ref, res_ref,
                        a_ref, wo_ref, o_ref):
    a = a_ref[...]
    sr = sr_ref[...].astype(jnp.float32)
    rw = rw_ref[...].astype(jnp.float32)
    srh = srh_ref[...].astype(jnp.float32)
    rwh = rwh_ref[...].astype(jnp.float32)
    blended = a * (sr * rw) + (1.0 - a) * (srh * rwh)
    # fused residual add + output projection
    o_ref[...] = res_ref[...] + jnp.dot(blended.astype(jnp.bfloat16), wo_ref[...],
                                        preferred_element_type=jnp.float32)


def _wkv_kernel(w_ref, u_ref, k_ref, v_ref, y_ref, pf_ref, qf_ref, of_ref):
    # Bi-directional WKV (Vision-RWKV), per channel c:
    #   y_t = ( sum_{i<t} e^{-(t-1-i)w + k_i} v_i
    #         + sum_{i>t} e^{-(i-1-t)w + k_i} v_i
    #         + e^{u + k_t} v_t ) / (same with v_i -> 1)
    # computed as a forward + backward linear decay scan carrying
    # (p, q, o) = (normalized numerator, normalized denominator, running max).
    #
    # Layout: k/v/y are (L, B, Ct) -> each step works on a dense (B, Ct) slab
    # (batch on sublanes, channels on lanes); all batches share one serial
    # loop of length L.
    w = w_ref[...]                       # (1, Ct), broadcasts over B rows
    u = u_ref[...]                       # (1, Ct)
    L, B, Ct = k_ref.shape

    zero = jnp.zeros((B, Ct), jnp.float32)
    minv = jnp.full((B, Ct), MIN_EXP, jnp.float32)

    def fwd_step(t, carry):
        p, q, o = carry
        # state BEFORE incorporating token t  ==  sum over i < t
        pf_ref[t] = p
        qf_ref[t] = q
        of_ref[t] = o
        kt = k_ref[t].astype(jnp.float32)
        vt = v_ref[t].astype(jnp.float32)
        ow = o - w
        no = jnp.maximum(ow, kt)
        ea = jnp.exp(ow - no)
        eb = jnp.exp(kt - no)
        return (ea * p + eb * vt, ea * q + eb, no)

    lax.fori_loop(0, L, fwd_step, (zero, zero, minv))

    def bwd_step(s, carry):
        p, q, o = carry                  # sum over i > t (state before token t)
        t = L - 1 - s
        kt = k_ref[t].astype(jnp.float32)
        vt = v_ref[t].astype(jnp.float32)
        pf = pf_ref[t]
        qf = qf_ref[t]
        of = of_ref[t]
        ku = u + kt
        no = jnp.maximum(jnp.maximum(of, o), ku)
        ef = jnp.exp(of - no)
        eb = jnp.exp(o - no)
        eu = jnp.exp(ku - no)
        num = ef * pf + eb * p + eu * vt
        den = ef * qf + eb * q + eu
        y_ref[t] = (num * pl.reciprocal(den, approx=True)).astype(y_ref.dtype)
        # update backward state with token t
        ow = o - w
        nb = jnp.maximum(ow, kt)
        ea2 = jnp.exp(ow - nb)
        eb2 = jnp.exp(kt - nb)
        return (ea2 * p + eb2 * vt, ea2 * q + eb2, nb)

    lax.fori_loop(0, L, bwd_step, (zero, zero, minv))


# --------------------------------------------------------------------------
# Pallas wrappers
# --------------------------------------------------------------------------

def layernorm(x2d, g, b, out_dtype=jnp.bfloat16):
    M, C = x2d.shape
    tm = _pick_tile_m(M, 16 * C)
    act = pl.BlockSpec((tm, C), lambda i: (i, 0))
    out = pl.BlockSpec((tm, C), lambda i: (i, 0))
    vec = pl.BlockSpec((1, C), lambda i: (0, 0))
    return pl.pallas_call(
        _layernorm_kernel,
        out_shape=jax.ShapeDtypeStruct((M, C), out_dtype),
        grid=(M // tm,),
        in_specs=[act, vec, vec],
        out_specs=out,
        compiler_params=_mparams(("parallel",)),
    )(x2d, g, b)


def spatial_mixproj(x, xx, mk, mv, mr, wk, wv, wr):
    M, C = x.shape
    tm = _pick_tile_m(M, 24 * C)
    act = pl.BlockSpec((tm, C), lambda i: (i, 0))
    vec = pl.BlockSpec((1, C), lambda i: (0, 0))
    wgt = pl.BlockSpec((C, C), lambda i: (0, 0))
    out = jax.ShapeDtypeStruct((M, C), jnp.bfloat16)
    return pl.pallas_call(
        _spatial_mixproj_kernel,
        out_shape=(out, out, out),
        grid=(M // tm,),
        in_specs=[act, act, vec, vec, vec, wgt, wgt, wgt],
        out_specs=(act, act, act),
        compiler_params=_mparams(("parallel",)),
    )(x, xx, mk, mv, mr, wk, wv, wr)


def channel_mix_pallas(x, xx, res, mk, mr, wkey, wval, wrec):
    M, C = x.shape
    HID = wkey.shape[1]
    tm = _pick_tile_m(M, 36 * C)
    th = _pick_tile_h(HID)
    act = pl.BlockSpec((tm, C), lambda i, h: (i, 0))
    vec = pl.BlockSpec((1, C), lambda i, h: (0, 0))
    return pl.pallas_call(
        _channel_mix_kernel,
        out_shape=jax.ShapeDtypeStruct((M, C), jnp.float32),
        grid=(M // tm, HID // th),
        in_specs=[act, act, act, vec, vec,
                  pl.BlockSpec((C, th), lambda i, h: (0, h)),
                  pl.BlockSpec((th, C), lambda i, h: (h, 0)),
                  pl.BlockSpec((C, C), lambda i, h: (0, 0))],
        out_specs=act,
        scratch_shapes=[pltpu.VMEM((tm, C), jnp.float32),
                        pltpu.VMEM((tm, C), jnp.bfloat16)],
        compiler_params=_mparams(("parallel", "arbitrary")),
    )(x, xx, res, mk, mr, wkey, wval, wrec)


def combine_out(sr, rw, srh, rwh, res, alpha, wo):
    M, C = sr.shape
    tm = _pick_tile_m(M, 32 * C)
    act = pl.BlockSpec((tm, C), lambda i: (i, 0))
    vec = pl.BlockSpec((1, C), lambda i: (0, 0))
    wgt = pl.BlockSpec((C, C), lambda i: (0, 0))
    return pl.pallas_call(
        _combine_out_kernel,
        out_shape=jax.ShapeDtypeStruct((M, C), jnp.float32),
        grid=(M // tm,),
        in_specs=[act, act, act, act, act, vec, wgt],
        out_specs=act,
        compiler_params=_mparams(("parallel",)),
    )(sr, rw, srh, rwh, res, alpha, wo)


def wkv(w, u, k_lbc, v_lbc):
    """Bi-directional WKV.  k_lbc/v_lbc: (L, B, C) bf16 -> y: (L, B, C) bf16."""
    L, B, C = k_lbc.shape
    tc = _pick_tile_c(C)
    seq = pl.BlockSpec((L, B, tc), lambda c: (0, 0, c))
    vec = pl.BlockSpec((1, tc), lambda c: (0, c))
    cost = pl.CostEstimate(flops=int(26 * B * L * C),
                           transcendentals=int(8 * B * L * C),
                           bytes_accessed=int(3 * B * L * C * 2 + 2 * C * 4))
    return pl.pallas_call(
        _wkv_kernel,
        out_shape=jax.ShapeDtypeStruct((L, B, C), jnp.bfloat16),
        grid=(C // tc,),
        in_specs=[vec, vec, seq, seq],
        out_specs=seq,
        scratch_shapes=[pltpu.VMEM((L, B, tc), jnp.float32),
                        pltpu.VMEM((L, B, tc), jnp.float32),
                        pltpu.VMEM((L, B, tc), jnp.float32)],
        compiler_params=_mparams(("parallel",)),
        cost_estimate=cost,
    )(w.reshape(1, C), u.reshape(1, C), k_lbc, v_lbc)


# --------------------------------------------------------------------------
# Glue (plain JAX)
# --------------------------------------------------------------------------

def bi_token_shift(x, shift_pixel, gamma, patch_resolution):
    # TODO(synk): exact `bi_token_shift` source not provided with the module;
    # implemented q_shift-style: first gamma*C channels shifted +shift_pixel
    # along the token axis, next gamma*C channels shifted -shift_pixel,
    # remaining channels passed through (zero padding at the boundaries).
    B, N, C = x.shape
    g = int(gamma * C)
    zpad = jnp.zeros((B, shift_pixel, g), x.dtype)
    fwd = jnp.concatenate([zpad, x[:, :-shift_pixel, :g]], axis=1)
    bwd = jnp.concatenate([x[:, shift_pixel:, g:2 * g], zpad], axis=1)
    return jnp.concatenate([fwd, bwd, x[:, :, 2 * g:]], axis=2)


def thw_to_hwt(x, T, H, W):
    B, L, C = x.shape
    return x.reshape(B, T, H, W, C).transpose(0, 2, 3, 1, 4).reshape(B, L, C)


def hwt_to_thw(x, T, H, W):
    B, L, C = x.shape
    return x.reshape(B, H, W, T, C).transpose(0, 3, 1, 2, 4).reshape(B, L, C)


# --------------------------------------------------------------------------
# Module forward
# --------------------------------------------------------------------------

def spatial_mix_forward(ap, h, res, patch_resolution):
    """h: LN(x) in bf16, res: f32 residual stream. Returns res + SpatialMix(h)."""
    B, L, C = h.shape
    T, H, W = patch_resolution

    def branch(h_seq):
        xx = bi_token_shift(h_seq, SHIFT_PIXEL, CHANNEL_GAMMA, patch_resolution)
        k, v, sr = spatial_mixproj(
            h_seq.reshape(B * L, C), xx.reshape(B * L, C),
            ap['mix_k'], ap['mix_v'], ap['mix_r'],
            ap['wk'], ap['wv'], ap['wr'])
        # time on the slow axis, batch on sublanes for the WKV scan
        k_lbc = k.reshape(B, L, C).transpose(1, 0, 2)
        v_lbc = v.reshape(B, L, C).transpose(1, 0, 2)
        rw = wkv(ap['decay'] / L, ap['first'] / L, k_lbc, v_lbc)   # (L, B, C)
        return sr.reshape(B, L, C), rw.transpose(1, 0, 2)

    sr, rw = branch(h)

    h_hwt = thw_to_hwt(h, T, H, W)
    sr_h, rw_h = branch(h_hwt)
    # elementwise gate commutes with the permutation -> rearrange both first
    sr_h = hwt_to_thw(sr_h, T, H, W)
    rw_h = hwt_to_thw(rw_h, T, H, W)

    out = combine_out(sr.reshape(B * L, C), rw.reshape(B * L, C),
                      sr_h.reshape(B * L, C), rw_h.reshape(B * L, C),
                      res.reshape(B * L, C), ap['alpha'], ap['wo'])
    return out.reshape(B, L, C)


def channel_mix_forward(fp, h, res, patch_resolution):
    """h: LN(x) in bf16, res: f32 residual stream. Returns res + ChannelMix(h)."""
    B, L, C = h.shape
    xx = bi_token_shift(h, SHIFT_PIXEL, CHANNEL_GAMMA, patch_resolution)
    rkv = channel_mix_pallas(
        h.reshape(B * L, C), xx.reshape(B * L, C), res.reshape(B * L, C),
        fp['mix_k'], fp['mix_r'],
        fp['wkey'], fp['wval'], fp['wrec'])
    return rkv.reshape(B, L, C)


def block_forward(bp, x, patch_resolution, layer_id):
    B, L, C = x.shape
    M = B * L
    if layer_id == 0:
        x = layernorm(x.reshape(M, C), *bp['ln0'],
                      out_dtype=jnp.float32).reshape(B, L, C)
    h1 = layernorm(x.reshape(M, C), *bp['ln1'],
                   out_dtype=jnp.bfloat16).reshape(B, L, C)
    x = spatial_mix_forward(bp['att'], h1, x, patch_resolution)   # residual fused
    h2 = layernorm(x.reshape(M, C), *bp['ln2'],
                   out_dtype=jnp.bfloat16).reshape(B, L, C)
    x = channel_mix_forward(bp['ffn'], h2, x, patch_resolution)   # residual fused
    return x


def rwkv_forward(params, x, patch_resolution):
    for layer_id, bp in enumerate(params['blocks']):
        x = block_forward(bp, x, patch_resolution, layer_id)
    B, L, C = x.shape
    x = layernorm(x.reshape(B * L, C), *params['ln_out'],
                  out_dtype=jnp.float32).reshape(B, L, C)
    return x


# --------------------------------------------------------------------------
# Deterministic parameter construction (mirrors the 'fancy' init)
# --------------------------------------------------------------------------

def init_params(key, n_embd, n_layer, hidden_rate=4):
    C = n_embd
    HID = hidden_rate * C
    keyit = iter(jax.random.split(key, n_layer * 8 + 4))

    def lin(fan_in, fan_out):
        w = (jax.random.normal(next(keyit), (fan_in, fan_out), jnp.float32)
             * 0.02)
        return w.astype(jnp.bfloat16)     # bf16 weights at the MXU boundary

    def ln_pair():
        return (jnp.ones((1, C), jnp.float32), jnp.zeros((1, C), jnp.float32))

    blocks = []
    for layer_id in range(n_layer):
        ratio_0_to_1 = layer_id / (n_layer - 1) if n_layer > 1 else 0.0
        ratio_1_to_almost0 = 1.0 - layer_id / n_layer

        h_idx = np.arange(C, dtype=np.float64)
        decay = -5.0 + 8.0 * (h_idx / (C - 1)) ** (0.7 + 1.3 * ratio_0_to_1)
        zigzag = np.array([(i + 1) % 3 - 1 for i in range(C)],
                          dtype=np.float64) * 0.5
        first = np.ones(C) * math.log(0.3) + zigzag

        xvec = np.arange(C, dtype=np.float64) / C
        att_mix_k = xvec ** ratio_1_to_almost0
        att_mix_v = xvec ** ratio_1_to_almost0 + 0.3 * ratio_0_to_1
        att_mix_r = xvec ** (0.5 * ratio_1_to_almost0)
        ffn_mix = xvec ** ratio_1_to_almost0

        att = {
            'decay': jnp.asarray(decay, jnp.float32),
            'first': jnp.asarray(first, jnp.float32),
            'mix_k': jnp.asarray(att_mix_k, jnp.float32).reshape(1, C),
            'mix_v': jnp.asarray(att_mix_v, jnp.float32).reshape(1, C),
            'mix_r': jnp.asarray(att_mix_r, jnp.float32).reshape(1, C),
            'wk': lin(C, C),
            'wv': lin(C, C),
            'wr': lin(C, C),
            'wo': lin(C, C),
            'alpha': jnp.full((1, C), 0.5, jnp.float32),
        }
        ffn = {
            'mix_k': jnp.asarray(ffn_mix, jnp.float32).reshape(1, C),
            'mix_r': jnp.asarray(ffn_mix, jnp.float32).reshape(1, C),
            'wkey': lin(C, HID),
            'wval': lin(HID, C),
            'wrec': lin(C, C),
        }
        block = {
            'ln0': ln_pair() if layer_id == 0 else None,
            'ln1': ln_pair(),
            'ln2': ln_pair(),
            'att': att,
            'ffn': ffn,
        }
        blocks.append(block)

    return {'blocks': blocks, 'ln_out': ln_pair()}


# --------------------------------------------------------------------------
# Demo
# --------------------------------------------------------------------------

if __name__ == "__main__":
    n_embd, n_layer = 16, 2
    B = 2
    patch_resolution = (2, 4, 4)          # (T, H, W)
    L = patch_resolution[0] * patch_resolution[1] * patch_resolution[2]

    key = jax.random.PRNGKey(0)
    pkey, xkey = jax.random.split(key)
    params = init_params(pkey, n_embd, n_layer)
    x = jax.random.normal(xkey, (B, L, n_embd), jnp.float32)

    fwd = jax.jit(rwkv_forward, static_argnums=(2,))
    y = fwd(params, x, patch_resolution)
    y = jax.block_until_ready(y)

    assert y.shape == (B, L, n_embd)
    assert bool(jnp.all(jnp.isfinite(y)))
    print("KERNEL_OK")
</pallas_src>

<mosaic_0001>
module attributes {stable_mosaic.version = 11 : i64} {
  func.func @_layernorm_kernel(%arg0: i32, %arg1: memref<64x16xf32, #tpu.memory_space<vmem>>, %arg2: memref<1x16xf32, #tpu.memory_space<vmem>>, %arg3: memref<1x16xf32, #tpu.memory_space<vmem>>, %arg4: memref<64x16xbf16, #tpu.memory_space<vmem>>) attributes {dimension_semantics = [#tpu.dimension_semantics<parallel>], iteration_bounds = array<i64: 1>, scalar_prefetch = 0 : i64, scratch_operands = 0 : i64, tpu.core_type = #tpu.core_type<tc>, window_params = [{transform_indices = @transform_0, window_bounds = array<i64: 64, 16>}, {pipeline_mode = #tpu.pipeline_mode<synchronous>, transform_indices = @transform_1, window_bounds = array<i64: 1, 16>}, {pipeline_mode = #tpu.pipeline_mode<synchronous>, transform_indices = @transform_2, window_bounds = array<i64: 1, 16>}, {transform_indices = @transform_3, window_bounds = array<i64: 64, 16>}]} {
    %c0 = arith.constant 0 : index
    %c0_0 = arith.constant 0 : index
    %0 = vector.load %arg1[%c0, %c0_0] : memref<64x16xf32, #tpu.memory_space<vmem>>, vector<64x16xf32>
    %cst = arith.constant dense<0.000000e+00> : vector<64xf32>
    %1 = vector.multi_reduction <add>, %0, %cst [1] : vector<64x16xf32> to vector<64xf32>
    %2 = vector.shape_cast %1 : vector<64xf32> to vector<64x1xf32>
    %cst_1 = arith.constant 1.600000e+01 : f32
    %3 = vector.broadcast %cst_1 : f32 to vector<64x1xf32>
    %4 = arith.divf %2, %3 : vector<64x1xf32>
    %5 = vector.broadcast %4 : vector<64x1xf32> to vector<64x16xf32>
    %6 = arith.subf %0, %5 : vector<64x16xf32>
    %7 = arith.mulf %6, %6 : vector<64x16xf32>
    %cst_2 = arith.constant dense<0.000000e+00> : vector<64xf32>
    %8 = vector.multi_reduction <add>, %7, %cst_2 [1] : vector<64x16xf32> to vector<64xf32>
    %9 = vector.shape_cast %8 : vector<64xf32> to vector<64x1xf32>
    %cst_3 = arith.constant 1.600000e+01 : f32
    %10 = vector.broadcast %cst_3 : f32 to vector<64x1xf32>
    %11 = arith.divf %9, %10 : vector<64x1xf32>
    %cst_4 = arith.constant 9.99999974E-6 : f32
    %12 = vector.broadcast %cst_4 : f32 to vector<64x1xf32>
    %13 = arith.addf %11, %12 : vector<64x1xf32>
    %14 = math.rsqrt %13 : vector<64x1xf32>
    %15 = vector.broadcast %14 : vector<64x1xf32> to vector<64x16xf32>
    %16 = arith.mulf %6, %15 : vector<64x16xf32>
    %c0_5 = arith.constant 0 : index
    %c0_6 = arith.constant 0 : index
    %17 = vector.load %arg2[%c0_5, %c0_6] : memref<1x16xf32, #tpu.memory_space<vmem>>, vector<1x16xf32>
    %18 = vector.broadcast %17 : vector<1x16xf32> to vector<64x16xf32>
    %19 = arith.mulf %16, %18 : vector<64x16xf32>
    %c0_7 = arith.constant 0 : index
    %c0_8 = arith.constant 0 : index
    %20 = vector.load %arg3[%c0_7, %c0_8] : memref<1x16xf32, #tpu.memory_space<vmem>>, vector<1x16xf32>
    %21 = vector.broadcast %20 : vector<1x16xf32> to vector<64x16xf32>
    %22 = arith.addf %19, %21 : vector<64x16xf32>
    %23 = arith.truncf %22 : vector<64x16xf32> to vector<64x16xbf16>
    %c0_9 = arith.constant 0 : index
    %c0_10 = arith.constant 0 : index
    %24 = vector.load %arg4[%c0_9, %c0_10] : memref<64x16xbf16, #tpu.memory_space<vmem>>, vector<64x16xbf16>
    tpu.vector_store %arg4[%c0_9, %c0_10], %23 {strides = array<i32>} : memref<64x16xbf16, #tpu.memory_space<vmem>>, vector<64x16xbf16>,
    return
  }
  func.func @transform_0(%arg0: i32) -> (i32, i32) {
    %c0_i32 = arith.constant 0 : i32
    %c0_i32_0 = arith.constant 0 : i32
    return %arg0, %c0_i32 : i32, i32
  }
  func.func @transform_1(%arg0: i32) -> (i32, i32) {
    %c0_i32 = arith.constant 0 : i32
    %c0_i32_0 = arith.constant 0 : i32
    %c0_i32_1 = arith.constant 0 : i32
    return %c0_i32, %c0_i32_0 : i32, i32
  }
  func.func @transform_2(%arg0: i32) -> (i32, i32) {
    %c0_i32 = arith.constant 0 : i32
    %c0_i32_0 = arith.constant 0 : i32
    %c0_i32_1 = arith.constant 0 : i32
    return %c0_i32, %c0_i32_0 : i32, i32
  }
  func.func @transform_3(%arg0: i32) -> (i32, i32) {
    %c0_i32 = arith.constant 0 : i32
    %c0_i32_0 = arith.constant 0 : i32
    return %arg0, %c0_i32 : i32, i32
  }
}

module attributes {stable_mosaic.version = 11 : i64} {
  func.func @_layernorm_kernel(%arg0: i32, %arg1: memref<64x16xf32, #tpu.memory_space<vmem>>, %arg2: memref<1x16xf32, #tpu.memory_space<vmem>>, %arg3: memref<1x16xf32, #tpu.memory_space<vmem>>, %arg4: memref<64x16xf32, #tpu.memory_space<vmem>>) attributes {dimension_semantics = [#tpu.dimension_semantics<parallel>], iteration_bounds = array<i64: 1>, scalar_prefetch = 0 : i64, scratch_operands = 0 : i64, tpu.core_type = #tpu.core_type<tc>, window_params = [{transform_indices = @transform_0, window_bounds = array<i64: 64, 16>}, {pipeline_mode = #tpu.pipeline_mode<synchronous>, transform_indices = @transform_1, window_bounds = array<i64: 1, 16>}, {pipeline_mode = #tpu.pipeline_mode<synchronous>, transform_indices = @transform_2, window_bounds = array<i64: 1, 16>}, {transform_indices = @transform_3, window_bounds = array<i64: 64, 16>}]} {
    %c0 = arith.constant 0 : index
    %c0_0 = arith.constant 0 : index
    %0 = vector.load %arg1[%c0, %c0_0] : memref<64x16xf32, #tpu.memory_space<vmem>>, vector<64x16xf32>
    %cst = arith.constant dense<0.000000e+00> : vector<64xf32>
    %1 = vector.multi_reduction <add>, %0, %cst [1] : vector<64x16xf32> to vector<64xf32>
    %2 = vector.shape_cast %1 : vector<64xf32> to vector<64x1xf32>
    %cst_1 = arith.constant 1.600000e+01 : f32
    %3 = vector.broadcast %cst_1 : f32 to vector<64x1xf32>
    %4 = arith.divf %2, %3 : vector<64x1xf32>
    %5 = vector.broadcast %4 : vector<64x1xf32> to vector<64x16xf32>
    %6 = arith.subf %0, %5 : vector<64x16xf32>
    %7 = arith.mulf %6, %6 : vector<64x16xf32>
    %cst_2 = arith.constant dense<0.000000e+00> : vector<64xf32>
    %8 = vector.multi_reduction <add>, %7, %cst_2 [1] : vector<64x16xf32> to vector<64xf32>
    %9 = vector.shape_cast %8 : vector<64xf32> to vector<64x1xf32>
    %cst_3 = arith.constant 1.600000e+01 : f32
    %10 = vector.broadcast %cst_3 : f32 to vector<64x1xf32>
    %11 = arith.divf %9, %10 : vector<64x1xf32>
    %cst_4 = arith.constant 9.99999974E-6 : f32
    %12 = vector.broadcast %cst_4 : f32 to vector<64x1xf32>
    %13 = arith.addf %11, %12 : vector<64x1xf32>
    %14 = math.rsqrt %13 : vector<64x1xf32>
    %15 = vector.broadcast %14 : vector<64x1xf32> to vector<64x16xf32>
    %16 = arith.mulf %6, %15 : vector<64x16xf32>
    %c0_5 = arith.constant 0 : index
    %c0_6 = arith.constant 0 : index
    %17 = vector.load %arg2[%c0_5, %c0_6] : memref<1x16xf32, #tpu.memory_space<vmem>>, vector<1x16xf32>
    %18 = vector.broadcast %17 : vector<1x16xf32> to vector<64x16xf32>
    %19 = arith.mulf %16, %18 : vector<64x16xf32>
    %c0_7 = arith.constant 0 : index
    %c0_8 = arith.constant 0 : index
    %20 = vector.load %arg3[%c0_7, %c0_8] : memref<1x16xf32, #tpu.memory_space<vmem>>, vector<1x16xf32>
    %21 = vector.broadcast %20 : vector<1x16xf32> to vector<64x16xf32>
    %22 = arith.addf %19, %21 : vector<64x16xf32>
    %c0_9 = arith.constant 0 : index
    %c0_10 = arith.constant 0 : index
    %23 = vector.load %arg4[%c0_9, %c0_10] : memref<64x16xf32, #tpu.memory_space<vmem>>, vector<64x16xf32>
    tpu.vector_store %arg4[%c0_9, %c0_10], %22 {strides = array<i32>} : memref<64x16xf32, #tpu.memory_space<vmem>>, vector<64x16xf32>,
    return
  }
  func.func @transform_0(%arg0: i32) -> (i32, i32) {
    %c0_i32 = arith.constant 0 : i32
    %c0_i32_0 = arith.constant 0 : i32
    return %arg0, %c0_i32 : i32, i32
  }
  func.func @transform_1(%arg0: i32) -> (i32, i32) {
    %c0_i32 = arith.constant 0 : i32
    %c0_i32_0 = arith.constant 0 : i32
    %c0_i32_1 = arith.constant 0 : i32
    return %c0_i32, %c0_i32_0 : i32, i32
  }
  func.func @transform_2(%arg0: i32) -> (i32, i32) {
    %c0_i32 = arith.constant 0 : i32
    %c0_i32_0 = arith.constant 0 : i32
    %c0_i32_1 = arith.constant 0 : i32
    return %c0_i32, %c0_i32_0 : i32, i32
  }
  func.func @transform_3(%arg0: i32) -> (i32, i32) {
    %c0_i32 = arith.constant 0 : i32
    %c0_i32_0 = arith.constant 0 : i32
    return %arg0, %c0_i32 : i32, i32
  }
}

module attributes {stable_mosaic.version = 11 : i64} {
  func.func @_spatial_mixproj_kernel(%arg0: i32, %arg1: memref<64x16xbf16, #tpu.memory_space<vmem>>, %arg2: memref<64x16xbf16, #tpu.memory_space<vmem>>, %arg3: memref<1x16xf32, #tpu.memory_space<vmem>>, %arg4: memref<1x16xf32, #tpu.memory_space<vmem>>, %arg5: memref<1x16xf32, #tpu.memory_space<vmem>>, %arg6: memref<16x16xbf16, #tpu.memory_space<vmem>>, %arg7: memref<16x16xbf16, #tpu.memory_space<vmem>>, %arg8: memref<16x16xbf16, #tpu.memory_space<vmem>>, %arg9: memref<64x16xbf16, #tpu.memory_space<vmem>>, %arg10: memref<64x16xbf16, #tpu.memory_space<vmem>>, %arg11: memref<64x16xbf16, #tpu.memory_space<vmem>>) attributes {dimension_semantics = [#tpu.dimension_semantics<parallel>], iteration_bounds = array<i64: 1>, scalar_prefetch = 0 : i64, scratch_operands = 0 : i64, tpu.core_type = #tpu.core_type<tc>, window_params = [{transform_indices = @transform_0, window_bounds = array<i64: 64, 16>}, {transform_indices = @transform_1, window_bounds = array<i64: 64, 16>}, {pipeline_mode = #tpu.pipeline_mode<synchronous>, transform_indices = @transform_2, window_bounds = array<i64: 1, 16>}, {pipeline_mode = #tpu.pipeline_mode<synchronous>, transform_indices = @transform_3, window_bounds = array<i64: 1, 16>}, {pipeline_mode = #tpu.pipeline_mode<synchronous>, transform_indices = @transform_4, window_bounds = array<i64: 1, 16>}, {pipeline_mode = #tpu.pipeline_mode<synchronous>, transform_indices = @transform_5, window_bounds = array<i64: 16, 16>}, {pipeline_mode = #tpu.pipeline_mode<synchronous>, transform_indices = @transform_6, window_bounds = array<i64: 16, 16>}, {pipeline_mode = #tpu.pipeline_mode<synchronous>, transform_indices = @transform_7, window_bounds = array<i64: 16, 16>}, {transform_indices = @transform_8, window_bounds = array<i64: 64, 16>}, {transform_indices = @transform_9, window_bounds = array<i64: 64, 16>}, {transform_indices = @transform_10, window_bounds = array<i64: 64, 16>}]} {
    %c0 = arith.constant 0 : index
    %c0_0 = arith.constant 0 : index
    %0 = vector.load %arg1[%c0, %c0_0] : memref<64x16xbf16, #tpu.memory_space<vmem>>, vector<64x16xbf16>
    %1 = arith.extf %0 : vector<64x16xbf16> to vector<64x16xf32>
    %c0_1 = arith.constant 0 : index
    %c0_2 = arith.constant 0 : index
    %2 = vector.load %arg2[%c0_1, %c0_2] : memref<64x16xbf16, #tpu.memory_space<vmem>>, vector<64x16xbf16>
    %3 = arith.extf %2 : vector<64x16xbf16> to vector<64x16xf32>
    %c0_3 = arith.constant 0 : index
    %c0_4 = arith.constant 0 : index
    %4 = vector.load %arg3[%c0_3, %c0_4] : memref<1x16xf32, #tpu.memory_space<vmem>>, vector<1x16xf32>
    %c0_5 = arith.constant 0 : index
    %c0_6 = arith.constant 0 : index
    %5 = vector.load %arg4[%c0_5, %c0_6] : memref<1x16xf32, #tpu.memory_space<vmem>>, vector<1x16xf32>
    %c0_7 = arith.constant 0 : index
    %c0_8 = arith.constant 0 : index
    %6 = vector.load %arg5[%c0_7, %c0_8] : memref<1x16xf32, #tpu.memory_space<vmem>>, vector<1x16xf32>
    %7 = vector.broadcast %4 : vector<1x16xf32> to vector<64x16xf32>
    %8 = arith.mulf %1, %7 : vector<64x16xf32>
    %cst = arith.constant 1.000000e+00 : f32
    %9 = vector.broadcast %cst : f32 to vector<1x16xf32>
    %10 = arith.subf %9, %4 : vector<1x16xf32>
    %11 = vector.broadcast %10 : vector<1x16xf32> to vector<64x16xf32>
    %12 = arith.mulf %3, %11 : vector<64x16xf32>
    %13 = arith.addf %8, %12 : vector<64x16xf32>
    %14 = arith.truncf %13 : vector<64x16xf32> to vector<64x16xbf16>
    %15 = vector.broadcast %5 : vector<1x16xf32> to vector<64x16xf32>
    %16 = arith.mulf %1, %15 : vector<64x16xf32>
    %cst_9 = arith.constant 1.000000e+00 : f32
    %17 = vector.broadcast %cst_9 : f32 to vector<1x16xf32>
    %18 = arith.subf %17, %5 : vector<1x16xf32>
    %19 = vector.broadcast %18 : vector<1x16xf32> to vector<64x16xf32>
    %20 = arith.mulf %3, %19 : vector<64x16xf32>
    %21 = arith.addf %16, %20 : vector<64x16xf32>
    %22 = arith.truncf %21 : vector<64x16xf32> to vector<64x16xbf16>
    %23 = vector.broadcast %6 : vector<1x16xf32> to vector<64x16xf32>
    %24 = arith.mulf %1, %23 : vector<64x16xf32>
    %cst_10 = arith.constant 1.000000e+00 : f32
    %25 = vector.broadcast %cst_10 : f32 to vector<1x16xf32>
    %26 = arith.subf %25, %6 : vector<1x16xf32>
    %27 = vector.broadcast %26 : vector<1x16xf32> to vector<64x16xf32>
    %28 = arith.mulf %3, %27 : vector<64x16xf32>
    %29 = arith.addf %24, %28 : vector<64x16xf32>
    %30 = arith.truncf %29 : vector<64x16xf32> to vector<64x16xbf16>
    %c0_11 = arith.constant 0 : index
    %c0_12 = arith.constant 0 : index
    %31 = vector.load %arg6[%c0_11, %c0_12] : memref<16x16xbf16, #tpu.memory_space<vmem>>, vector<16x16xbf16>
    %cst_13 = arith.constant dense<0.000000e+00> : vector<64x16xf32>
    %32 = tpu.matmul %14, %31, %cst_13 {dimension_numbers = #tpu.dot_dimension_numbers<[1], [0], [0], [1], [0, 0, 1, 1], [], []>} : vector<64x16xbf16>, vector<16x16xbf16>, vector<64x16xf32> -> vector<64x16xf32>
    %33 = arith.truncf %32 : vector<64x16xf32> to vector<64x16xbf16>
    %c0_14 = arith.constant 0 : index
    %c0_15 = arith.constant 0 : index
    %34 = vector.load %arg9[%c0_14, %c0_15] : memref<64x16xbf16, #tpu.memory_space<vmem>>, vector<64x16xbf16>
    tpu.vector_store %arg9[%c0_14, %c0_15], %33 {strides = array<i32>} : memref<64x16xbf16, #tpu.memory_space<vmem>>, vector<64x16xbf16>,
    %c0_16 = arith.constant 0 : index
    %c0_17 = arith.constant 0 : index
    %35 = vector.load %arg7[%c0_16, %c0_17] : memref<16x16xbf16, #tpu.memory_space<vmem>>, vector<16x16xbf16>
    %cst_18 = arith.constant dense<0.000000e+00> : vector<64x16xf32>
    %36 = tpu.matmul %22, %35, %cst_18 {dimension_numbers = #tpu.dot_dimension_numbers<[1], [0], [0], [1], [0, 0, 1, 1], [], []>} : vector<64x16xbf16>, vector<16x16xbf16>, vector<64x16xf32> -> vector<64x16xf32>
    %37 = arith.truncf %36 : vector<64x16xf32> to vector<64x16xbf16>
    %c0_19 = arith.constant 0 : index
    %c0_20 = arith.constant 0 : index
    %38 = vector.load %arg10[%c0_19, %c0_20] : memref<64x16xbf16, #tpu.memory_space<vmem>>, vector<64x16xbf16>
    tpu.vector_store %arg10[%c0_19, %c0_20], %37 {strides = array<i32>} : memref<64x16xbf16, #tpu.memory_space<vmem>>, vector<64x16xbf16>,
    %c0_21 = arith.constant 0 : index
    %c0_22 = arith.constant 0 : index
    %39 = vector.load %arg8[%c0_21, %c0_22] : memref<16x16xbf16, #tpu.memory_space<vmem>>, vector<16x16xbf16>
    %cst_23 = arith.constant dense<0.000000e+00> : vector<64x16xf32>
    %40 = tpu.matmul %30, %39, %cst_23 {dimension_numbers = #tpu.dot_dimension_numbers<[1], [0], [0], [1], [0, 0, 1, 1], [], []>} : vector<64x16xbf16>, vector<16x16xbf16>, vector<64x16xf32> -> vector<64x16xf32>
    %41 = arith.negf %40 : vector<64x16xf32>
    %42 = math.exp %41 : vector<64x16xf32>
    %cst_24 = arith.constant 1.000000e+00 : f32
    %43 = vector.broadcast %cst_24 : f32 to vector<64x16xf32>
    %44 = arith.addf %43, %42 : vector<64x16xf32>
    %45 = arith.divf %43, %44 : vector<64x16xf32>
    %46 = arith.truncf %45 : vector<64x16xf32> to vector<64x16xbf16>
    %c0_25 = arith.constant 0 : index
    %c0_26 = arith.constant 0 : index
    %47 = vector.load %arg11[%c0_25, %c0_26] : memref<64x16xbf16, #tpu.memory_space<vmem>>, vector<64x16xbf16>
    tpu.vector_store %arg11[%c0_25, %c0_26], %46 {strides = array<i32>} : memref<64x16xbf16, #tpu.memory_space<vmem>>, vector<64x16xbf16>,
    return
  }
  func.func @transform_0(%arg0: i32) -> (i32, i32) {
    %c0_i32 = arith.constant 0 : i32
    %c0_i32_0 = arith.constant 0 : i32
    return %arg0, %c0_i32 : i32, i32
  }
  func.func @transform_1(%arg0: i32) -> (i32, i32) {
    %c0_i32 = arith.constant 0 : i32
    %c0_i32_0 = arith.constant 0 : i32
    return %arg0, %c0_i32 : i32, i32
  }
  func.func @transform_2(%arg0: i32) -> (i32, i32) {
    %c0_i32 = arith.constant 0 : i32
    %c0_i32_0 = arith.constant 0 : i32
    %c0_i32_1 = arith.constant 0 : i32
    return %c0_i32, %c0_i32_0 : i32, i32
  }
  func.func @transform_3(%arg0: i32) -> (i32, i32) {
    %c0_i32 = arith.constant 0 : i32
    %c0_i32_0 = arith.constant 0 : i32
    %c0_i32_1 = arith.constant 0 : i32
    return %c0_i32, %c0_i32_0 : i32, i32
  }
  func.func @transform_4(%arg0: i32) -> (i32, i32) {
    %c0_i32 = arith.constant 0 : i32
    %c0_i32_0 = arith.constant 0 : i32
    %c0_i32_1 = arith.constant 0 : i32
    return %c0_i32, %c0_i32_0 : i32, i32
  }
  func.func @transform_5(%arg0: i32) -> (i32, i32) {
    %c0_i32 = arith.constant 0 : i32
    %c0_i32_0 = arith.constant 0 : i32
    %c0_i32_1 = arith.constant 0 : i32
    return %c0_i32, %c0_i32_0 : i32, i32
  }
  func.func @transform_6(%arg0: i32) -> (i32, i32) {
    %c0_i32 = arith.constant 0 : i32
    %c0_i32_0 = arith.constant 0 : i32
    %c0_i32_1 = arith.constant 0 : i32
    return %c0_i32, %c0_i32_0 : i32, i32
  }
  func.func @transform_7(%arg0: i32) -> (i32, i32) {
    %c0_i32 = arith.constant 0 : i32
    %c0_i32_0 = arith.constant 0 : i32
    %c0_i32_1 = arith.constant 0 : i32
    return %c0_i32, %c0_i32_0 : i32, i32
  }
  func.func @transform_8(%arg0: i32) -> (i32, i32) {
    %c0_i32 = arith.constant 0 : i32
    %c0_i32_0 = arith.constant 0 : i32
    return %arg0, %c0_i32 : i32, i32
  }
  func.func @transform_9(%arg0: i32) -> (i32, i32) {
    %c0_i32 = arith.constant 0 : i32
    %c0_i32_0 = arith.constant 0 : i32
    return %arg0, %c0_i32 : i32, i32
  }
  func.func @transform_10(%arg0: i32) -> (i32, i32) {
    %c0_i32 = arith.constant 0 : i32
    %c0_i32_0 = arith.constant 0 : i32
    return %arg0, %c0_i32 : i32, i32
  }
}

module attributes {stable_mosaic.version = 11 : i64} {
  func.func @_wkv_kernel(%arg0: i32, %arg1: memref<1x16xf32, #tpu.memory_space<vmem>>, %arg2: memref<1x16xf32, #tpu.memory_space<vmem>>, %arg3: memref<32x2x16xbf16, #tpu.memory_space<vmem>>, %arg4: memref<32x2x16xbf16, #tpu.memory_space<vmem>>, %arg5: memref<32x2x16xbf16, #tpu.memory_space<vmem>>, %arg6: memref<32x2x16xf32, #tpu.memory_space<vmem>>, %arg7: memref<32x2x16xf32, #tpu.memory_space<vmem>>, %arg8: memref<32x2x16xf32, #tpu.memory_space<vmem>>) attributes {dimension_semantics = [#tpu.dimension_semantics<parallel>], iteration_bounds = array<i64: 1>, scalar_prefetch = 0 : i64, scratch_operands = 3 : i64, tpu.core_type = #tpu.core_type<tc>, window_params = [{transform_indices = @transform_0, window_bounds = array<i64: 1, 16>}, {transform_indices = @transform_1, window_bounds = array<i64: 1, 16>}, {transform_indices = @transform_2, window_bounds = array<i64: 32, 2, 16>}, {transform_indices = @transform_3, window_bounds = array<i64: 32, 2, 16>}, {transform_indices = @transform_4, window_bounds = array<i64: 32, 2, 16>}]} {
    %c0 = arith.constant 0 : index
    %c0_0 = arith.constant 0 : index
    %0 = vector.load %arg1[%c0, %c0_0] : memref<1x16xf32, #tpu.memory_space<vmem>>, vector<1x16xf32>
    %c0_1 = arith.constant 0 : index
    %c0_2 = arith.constant 0 : index
    %1 = vector.load %arg2[%c0_1, %c0_2] : memref<1x16xf32, #tpu.memory_space<vmem>>, vector<1x16xf32>
    %cst = arith.constant 0.000000e+00 : f32
    %2 = vector.broadcast %cst : f32 to vector<2x16xf32>
    %cst_3 = arith.constant -9.99999968E+37 : f32
    %3 = vector.broadcast %cst_3 : f32 to vector<2x16xf32>
    %c0_i32 = arith.constant 0 : i32
    %c32_i32 = arith.constant 32 : i32
    %4 = arith.addi %c0_i32, %c32_i32 : i32
    %c1_i32 = arith.constant 1 : i32
    %5:3 = scf.for %arg9 = %c0_i32 to %4 step %c1_i32 iter_args(%arg10 = %2, %arg11 = %2, %arg12 = %3) -> (vector<2x16xf32>, vector<2x16xf32>, vector<2x16xf32>)  : i32 {
      %8 = arith.index_cast %arg9 : i32 to index
      %c0_9 = arith.constant 0 : index
      %c0_10 = arith.constant 0 : index
      %9 = vector.load %arg6[%8, %c0_9, %c0_10] : memref<32x2x16xf32, #tpu.memory_space<vmem>>, vector<1x2x16xf32>
      %10 = vector.shape_cast %9 : vector<1x2x16xf32> to vector<2x16xf32>
      %11 = vector.shape_cast %arg10 : vector<2x16xf32> to vector<1x2x16xf32>
      tpu.vector_store %arg6[%8, %c0_9, %c0_10], %11 {strides = array<i32>} : memref<32x2x16xf32, #tpu.memory_space<vmem>>, vector<1x2x16xf32>,
      %12 = arith.index_cast %arg9 : i32 to index
      %c0_11 = arith.constant 0 : index
      %c0_12 = arith.constant 0 : index
      %13 = vector.load %arg7[%12, %c0_11, %c0_12] : memref<32x2x16xf32, #tpu.memory_space<vmem>>, vector<1x2x16xf32>
      %14 = vector.shape_cast %13 : vector<1x2x16xf32> to vector<2x16xf32>
      %15 = vector.shape_cast %arg11 : vector<2x16xf32> to vector<1x2x16xf32>
      tpu.vector_store %arg7[%12, %c0_11, %c0_12], %15 {strides = array<i32>} : memref<32x2x16xf32, #tpu.memory_space<vmem>>, vector<1x2x16xf32>,
      %16 = arith.index_cast %arg9 : i32 to index
      %c0_13 = arith.constant 0 : index
      %c0_14 = arith.constant 0 : index
      %17 = vector.load %arg8[%16, %c0_13, %c0_14] : memref<32x2x16xf32, #tpu.memory_space<vmem>>, vector<1x2x16xf32>
      %18 = vector.shape_cast %17 : vector<1x2x16xf32> to vector<2x16xf32>
      %19 = vector.shape_cast %arg12 : vector<2x16xf32> to vector<1x2x16xf32>
      tpu.vector_store %arg8[%16, %c0_13, %c0_14], %19 {strides = array<i32>} : memref<32x2x16xf32, #tpu.memory_space<vmem>>, vector<1x2x16xf32>,
      %20 = arith.index_cast %arg9 : i32 to index
      %c0_15 = arith.constant 0 : index
      %c0_16 = arith.constant 0 : index
      %21 = vector.load %arg3[%20, %c0_15, %c0_16] : memref<32x2x16xbf16, #tpu.memory_space<vmem>>, vector<1x2x16xbf16>
      %22 = vector.shape_cast %21 : vector<1x2x16xbf16> to vector<2x16xbf16>
      %23 = arith.extf %22 : vector<2x16xbf16> to vector<2x16xf32>
      %24 = arith.index_cast %arg9 : i32 to index
      %c0_17 = arith.constant 0 : index
      %c0_18 = arith.constant 0 : index
      %25 = vector.load %arg4[%24, %c0_17, %c0_18] : memref<32x2x16xbf16, #tpu.memory_space<vmem>>, vector<1x2x16xbf16>
      %26 = vector.shape_cast %25 : vector<1x2x16xbf16> to vector<2x16xbf16>
      %27 = arith.extf %26 : vector<2x16xbf16> to vector<2x16xf32>
      %28 = vector.broadcast %0 : vector<1x16xf32> to vector<2x16xf32>
      %29 = arith.subf %arg12, %28 : vector<2x16xf32>
      %30 = arith.maximumf %29, %23 : vector<2x16xf32>
      %31 = arith.subf %29, %30 : vector<2x16xf32>
      %32 = math.exp %31 : vector<2x16xf32>
      %33 = arith.subf %23, %30 : vector<2x16xf32>
      %34 = math.exp %33 : vector<2x16xf32>
      %35 = arith.mulf %32, %arg10 : vector<2x16xf32>
      %36 = arith.mulf %34, %27 : vector<2x16xf32>
      %37 = arith.addf %35, %36 : vector<2x16xf32>
      %38 = arith.mulf %32, %arg11 : vector<2x16xf32>
      %39 = arith.addf %38, %34 : vector<2x16xf32>
      scf.yield %37, %39, %30 : vector<2x16xf32>, vector<2x16xf32>, vector<2x16xf32>
    }
    %c32_i32_4 = arith.constant 32 : i32
    %c0_i32_5 = arith.constant 0 : i32
    %c32_i32_6 = arith.constant 32 : i32
    %6 = arith.addi %c0_i32_5, %c32_i32_6 : i32
    %c1_i32_7 = arith.constant 1 : i32
    %7:3 = scf.for %arg9 = %c0_i32_5 to %6 step %c1_i32_7 iter_args(%arg10 = %2, %arg11 = %2, %arg12 = %3) -> (vector<2x16xf32>, vector<2x16xf32>, vector<2x16xf32>)  : i32 {
      %c31_i32 = arith.constant 31 : i32
      %8 = arith.subi %c31_i32, %arg9 : i32
      %9 = arith.index_cast %8 : i32 to index
      %c0_9 = arith.constant 0 : index
      %c0_10 = arith.constant 0 : index
      %10 = vector.load %arg3[%9, %c0_9, %c0_10] : memref<32x2x16xbf16, #tpu.memory_space<vmem>>, vector<1x2x16xbf16>
      %11 = vector.shape_cast %10 : vector<1x2x16xbf16> to vector<2x16xbf16>
      %12 = arith.extf %11 : vector<2x16xbf16> to vector<2x16xf32>
      %13 = arith.index_cast %8 : i32 to index
      %c0_11 = arith.constant 0 : index
      %c0_12 = arith.constant 0 : index
      %14 = vector.load %arg4[%13, %c0_11, %c0_12] : memref<32x2x16xbf16, #tpu.memory_space<vmem>>, vector<1x2x16xbf16>
      %15 = vector.shape_cast %14 : vector<1x2x16xbf16> to vector<2x16xbf16>
      %16 = arith.extf %15 : vector<2x16xbf16> to vector<2x16xf32>
      %17 = arith.index_cast %8 : i32 to index
      %c0_13 = arith.constant 0 : index
      %c0_14 = arith.constant 0 : index
      %18 = vector.load %arg6[%17, %c0_13, %c0_14] : memref<32x2x16xf32, #tpu.memory_space<vmem>>, vector<1x2x16xf32>
      %19 = vector.shape_cast %18 : vector<1x2x16xf32> to vector<2x16xf32>
      %20 = arith.index_cast %8 : i32 to index
      %c0_15 = arith.constant 0 : index
      %c0_16 = arith.constant 0 : index
      %21 = vector.load %arg7[%20, %c0_15, %c0_16] : memref<32x2x16xf32, #tpu.memory_space<vmem>>, vector<1x2x16xf32>
      %22 = vector.shape_cast %21 : vector<1x2x16xf32> to vector<2x16xf32>
      %23 = arith.index_cast %8 : i32 to index
      %c0_17 = arith.constant 0 : index
      %c0_18 = arith.constant 0 : index
      %24 = vector.load %arg8[%23, %c0_17, %c0_18] : memref<32x2x16xf32, #tpu.memory_space<vmem>>, vector<1x2x16xf32>
      %25 = vector.shape_cast %24 : vector<1x2x16xf32> to vector<2x16xf32>
      %26 = vector.broadcast %1 : vector<1x16xf32> to vector<2x16xf32>
      %27 = arith.addf %26, %12 : vector<2x16xf32>
      %28 = arith.maximumf %25, %arg12 : vector<2x16xf32>
      %29 = arith.maximumf %28, %27 : vector<2x16xf32>
      %30 = arith.subf %25, %29 : vector<2x16xf32>
      %31 = math.exp %30 : vector<2x16xf32>
      %32 = arith.subf %arg12, %29 : vector<2x16xf32>
      %33 = math.exp %32 : vector<2x16xf32>
      %34 = arith.subf %27, %29 : vector<2x16xf32>
      %35 = math.exp %34 : vector<2x16xf32>
      %36 = arith.mulf %31, %19 : vector<2x16xf32>
      %37 = arith.mulf %33, %arg10 : vector<2x16xf32>
      %38 = arith.addf %36, %37 : vector<2x16xf32>
      %39 = arith.mulf %35, %16 : vector<2x16xf32>
      %40 = arith.addf %38, %39 : vector<2x16xf32>
      %41 = arith.mulf %31, %22 : vector<2x16xf32>
      %42 = arith.mulf %33, %arg11 : vector<2x16xf32>
      %43 = arith.addf %41, %42 : vector<2x16xf32>
      %44 = arith.addf %43, %35 : vector<2x16xf32>
      %45 = tpu.reciprocal %44 {approx = true} : vector<2x16xf32> -> vector<2x16xf32>
      %46 = arith.mulf %40, %45 : vector<2x16xf32>
      %47 = arith.truncf %46 : vector<2x16xf32> to vector<2x16xbf16>
      %48 = arith.index_cast %8 : i32 to index
      %c0_19 = arith.constant 0 : index
      %c0_20 = arith.constant 0 : index
      %49 = vector.load %arg5[%48, %c0_19, %c0_20] : memref<32x2x16xbf16, #tpu.memory_space<vmem>>, vector<1x2x16xbf16>
      %50 = vector.shape_cast %49 : vector<1x2x16xbf16> to vector<2x16xbf16>
      %51 = vector.shape_cast %47 : vector<2x16xbf16> to vector<1x2x16xbf16>
      tpu.vector_store %arg5[%48, %c0_19, %c0_20], %51 {strides = array<i32>} : memref<32x2x16xbf16, #tpu.memory_space<vmem>>, vector<1x2x16xbf16>,
      %52 = vector.broadcast %0 : vector<1x16xf32> to vector<2x16xf32>
      %53 = arith.subf %arg12, %52 : vector<2x16xf32>
      %54 = arith.maximumf %53, %12 : vector<2x16xf32>
      %55 = arith.subf %53, %54 : vector<2x16xf32>
      %56 = math.exp %55 : vector<2x16xf32>
      %57 = arith.subf %12, %54 : vector<2x16xf32>
      %58 = math.exp %57 : vector<2x16xf32>
      %59 = arith.mulf %56, %arg10 : vector<2x16xf32>
      %60 = arith.mulf %58, %16 : vector<2x16xf32>
      %61 = arith.addf %59, %60 : vector<2x16xf32>
      %62 = arith.mulf %56, %arg11 : vector<2x16xf32>
      %63 = arith.addf %62, %58 : vector<2x16xf32>
      scf.yield %61, %63, %54 : vector<2x16xf32>, vector<2x16xf32>, vector<2x16xf32>
    }
    %c32_i32_8 = arith.constant 32 : i32
    return
  }
  func.func @transform_0(%arg0: i32) -> (i32, i32) {
    %c0_i32 = arith.constant 0 : i32
    %c0_i32_0 = arith.constant 0 : i32
    return %c0_i32, %arg0 : i32, i32
  }
  func.func @transform_1(%arg0: i32) -> (i32, i32) {
    %c0_i32 = arith.constant 0 : i32
    %c0_i32_0 = arith.constant 0 : i32
    return %c0_i32, %arg0 : i32, i32
  }
  func.func @transform_2(%arg0: i32) -> (i32, i32, i32) {
    %c0_i32 = arith.constant 0 : i32
    %c0_i32_0 = arith.constant 0 : i32
    %c0_i32_1 = arith.constant 0 : i32
    return %c0_i32, %c0_i32_0, %arg0 : i32, i32, i32
  }
  func.func @transform_3(%arg0: i32) -> (i32, i32, i32) {
    %c0_i32 = arith.constant 0 : i32
    %c0_i32_0 = arith.constant 0 : i32
    %c0_i32_1 = arith.constant 0 : i32
    return %c0_i32, %c0_i32_0, %arg0 : i32, i32, i32
  }
  func.func @transform_4(%arg0: i32) -> (i32, i32, i32) {
    %c0_i32 = arith.constant 0 : i32
    %c0_i32_0 = arith.constant 0 : i32
    %c0_i32_1 = arith.constant 0 : i32
    return %c0_i32, %c0_i32_0, %arg0 : i32, i32, i32
  }
}

module attributes {stable_mosaic.version = 11 : i64} {
  func.func @_combine_out_kernel(%arg0: i32, %arg1: memref<64x16xbf16, #tpu.memory_space<vmem>>, %arg2: memref<64x16xbf16, #tpu.memory_space<vmem>>, %arg3: memref<64x16xbf16, #tpu.memory_space<vmem>>, %arg4: memref<64x16xbf16, #tpu.memory_space<vmem>>, %arg5: memref<64x16xf32, #tpu.memory_space<vmem>>, %arg6: memref<1x16xf32, #tpu.memory_space<vmem>>, %arg7: memref<16x16xbf16, #tpu.memory_space<vmem>>, %arg8: memref<64x16xf32, #tpu.memory_space<vmem>>) attributes {dimension_semantics = [#tpu.dimension_semantics<parallel>], iteration_bounds = array<i64: 1>, scalar_prefetch = 0 : i64, scratch_operands = 0 : i64, tpu.core_type = #tpu.core_type<tc>, window_params = [{transform_indices = @transform_0, window_bounds = array<i64: 64, 16>}, {transform_indices = @transform_1, window_bounds = array<i64: 64, 16>}, {transform_indices = @transform_2, window_bounds = array<i64: 64, 16>}, {transform_indices = @transform_3, window_bounds = array<i64: 64, 16>}, {transform_indices = @transform_4, window_bounds = array<i64: 64, 16>}, {pipeline_mode = #tpu.pipeline_mode<synchronous>, transform_indices = @transform_5, window_bounds = array<i64: 1, 16>}, {pipeline_mode = #tpu.pipeline_mode<synchronous>, transform_indices = @transform_6, window_bounds = array<i64: 16, 16>}, {transform_indices = @transform_7, window_bounds = array<i64: 64, 16>}]} {
    %c0 = arith.constant 0 : index
    %c0_0 = arith.constant 0 : index
    %0 = vector.load %arg6[%c0, %c0_0] : memref<1x16xf32, #tpu.memory_space<vmem>>, vector<1x16xf32>
    %c0_1 = arith.constant 0 : index
    %c0_2 = arith.constant 0 : index
    %1 = vector.load %arg1[%c0_1, %c0_2] : memref<64x16xbf16, #tpu.memory_space<vmem>>, vector<64x16xbf16>
    %2 = arith.extf %1 : vector<64x16xbf16> to vector<64x16xf32>
    %c0_3 = arith.constant 0 : index
    %c0_4 = arith.constant 0 : index
    %3 = vector.load %arg2[%c0_3, %c0_4] : memref<64x16xbf16, #tpu.memory_space<vmem>>, vector<64x16xbf16>
    %4 = arith.extf %3 : vector<64x16xbf16> to vector<64x16xf32>
    %c0_5 = arith.constant 0 : index
    %c0_6 = arith.constant 0 : index
    %5 = vector.load %arg3[%c0_5, %c0_6] : memref<64x16xbf16, #tpu.memory_space<vmem>>, vector<64x16xbf16>
    %6 = arith.extf %5 : vector<64x16xbf16> to vector<64x16xf32>
    %c0_7 = arith.constant 0 : index
    %c0_8 = arith.constant 0 : index
    %7 = vector.load %arg4[%c0_7, %c0_8] : memref<64x16xbf16, #tpu.memory_space<vmem>>, vector<64x16xbf16>
    %8 = arith.extf %7 : vector<64x16xbf16> to vector<64x16xf32>
    %9 = arith.mulf %2, %4 : vector<64x16xf32>
    %10 = vector.broadcast %0 : vector<1x16xf32> to vector<64x16xf32>
    %11 = arith.mulf %10, %9 : vector<64x16xf32>
    %cst = arith.constant 1.000000e+00 : f32
    %12 = vector.broadcast %cst : f32 to vector<1x16xf32>
    %13 = arith.subf %12, %0 : vector<1x16xf32>
    %14 = arith.mulf %6, %8 : vector<64x16xf32>
    %15 = vector.broadcast %13 : vector<1x16xf32> to vector<64x16xf32>
    %16 = arith.mulf %15, %14 : vector<64x16xf32>
    %17 = arith.addf %11, %16 : vector<64x16xf32>
    %c0_9 = arith.constant 0 : index
    %c0_10 = arith.constant 0 : index
    %18 = vector.load %arg5[%c0_9, %c0_10] : memref<64x16xf32, #tpu.memory_space<vmem>>, vector<64x16xf32>
    %19 = arith.truncf %17 : vector<64x16xf32> to vector<64x16xbf16>
    %c0_11 = arith.constant 0 : index
    %c0_12 = arith.constant 0 : index
    %20 = vector.load %arg7[%c0_11, %c0_12] : memref<16x16xbf16, #tpu.memory_space<vmem>>, vector<16x16xbf16>
    %cst_13 = arith.constant dense<0.000000e+00> : vector<64x16xf32>
    %21 = tpu.matmul %19, %20, %cst_13 {dimension_numbers = #tpu.dot_dimension_numbers<[1], [0], [0], [1], [0, 0, 1, 1], [], []>} : vector<64x16xbf16>, vector<16x16xbf16>, vector<64x16xf32> -> vector<64x16xf32>
    %22 = arith.addf %18, %21 : vector<64x16xf32>
    %c0_14 = arith.constant 0 : index
    %c0_15 = arith.constant 0 : index
    %23 = vector.load %arg8[%c0_14, %c0_15] : memref<64x16xf32, #tpu.memory_space<vmem>>, vector<64x16xf32>
    tpu.vector_store %arg8[%c0_14, %c0_15], %22 {strides = array<i32>} : memref<64x16xf32, #tpu.memory_space<vmem>>, vector<64x16xf32>,
    return
  }
  func.func @transform_0(%arg0: i32) -> (i32, i32) {
    %c0_i32 = arith.constant 0 : i32
    %c0_i32_0 = arith.constant 0 : i32
    return %arg0, %c0_i32 : i32, i32
  }
  func.func @transform_1(%arg0: i32) -> (i32, i32) {
    %c0_i32 = arith.constant 0 : i32
    %c0_i32_0 = arith.constant 0 : i32
    return %arg0, %c0_i32 : i32, i32
  }
  func.func @transform_2(%arg0: i32) -> (i32, i32) {
    %c0_i32 = arith.constant 0 : i32
    %c0_i32_0 = arith.constant 0 : i32
    return %arg0, %c0_i32 : i32, i32
  }
  func.func @transform_3(%arg0: i32) -> (i32, i32) {
    %c0_i32 = arith.constant 0 : i32
    %c0_i32_0 = arith.constant 0 : i32
    return %arg0, %c0_i32 : i32, i32
  }
  func.func @transform_4(%arg0: i32) -> (i32, i32) {
    %c0_i32 = arith.constant 0 : i32
    %c0_i32_0 = arith.constant 0 : i32
    return %arg0, %c0_i32 : i32, i32
  }
  func.func @transform_5(%arg0: i32) -> (i32, i32) {
    %c0_i32 = arith.constant 0 : i32
    %c0_i32_0 = arith.constant 0 : i32
    %c0_i32_1 = arith.constant 0 : i32
    return %c0_i32, %c0_i32_0 : i32, i32
  }
  func.func @transform_6(%arg0: i32) -> (i32, i32) {
    %c0_i32 = arith.constant 0 : i32
    %c0_i32_0 = arith.constant 0 : i32
    %c0_i32_1 = arith.constant 0 : i32
    return %c0_i32, %c0_i32_0 : i32, i32
  }
  func.func @transform_7(%arg0: i32) -> (i32, i32) {
    %c0_i32 = arith.constant 0 : i32
    %c0_i32_0 = arith.constant 0 : i32
    return %arg0, %c0_i32 : i32, i32
  }
}

module attributes {stable_mosaic.version = 11 : i64} {
  func.func @_channel_mix_kernel(%arg0: i32, %arg1: i32, %arg2: memref<64x16xbf16, #tpu.memory_space<vmem>>, %arg3: memref<64x16xbf16, #tpu.memory_space<vmem>>, %arg4: memref<64x16xf32, #tpu.memory_space<vmem>>, %arg5: memref<1x16xf32, #tpu.memory_space<vmem>>, %arg6: memref<1x16xf32, #tpu.memory_space<vmem>>, %arg7: memref<16x64xbf16, #tpu.memory_space<vmem>>, %arg8: memref<64x16xbf16, #tpu.memory_space<vmem>>, %arg9: memref<16x16xbf16, #tpu.memory_space<vmem>>, %arg10: memref<64x16xf32, #tpu.memory_space<vmem>>, %arg11: memref<64x16xf32, #tpu.memory_space<vmem>>, %arg12: memref<64x16xbf16, #tpu.memory_space<vmem>>) attributes {dimension_semantics = [#tpu.dimension_semantics<parallel>, #tpu.dimension_semantics<arbitrary>], iteration_bounds = array<i64: 1, 1>, scalar_prefetch = 0 : i64, scratch_operands = 2 : i64, tpu.core_type = #tpu.core_type<tc>, window_params = [{transform_indices = @transform_0, window_bounds = array<i64: 64, 16>}, {transform_indices = @transform_1, window_bounds = array<i64: 64, 16>}, {transform_indices = @transform_2, window_bounds = array<i64: 64, 16>}, {pipeline_mode = #tpu.pipeline_mode<synchronous>, transform_indices = @transform_3, window_bounds = array<i64: 1, 16>}, {pipeline_mode = #tpu.pipeline_mode<synchronous>, transform_indices = @transform_4, window_bounds = array<i64: 1, 16>}, {transform_indices = @transform_5, window_bounds = array<i64: 16, 64>}, {transform_indices = @transform_6, window_bounds = array<i64: 64, 16>}, {pipeline_mode = #tpu.pipeline_mode<synchronous>, transform_indices = @transform_7, window_bounds = array<i64: 16, 16>}, {transform_indices = @transform_8, window_bounds = array<i64: 64, 16>}]} {
    %c0_i32 = arith.constant 0 : i32
    %0 = arith.cmpi eq, %arg1, %c0_i32 : i32
    %1 = arith.extui %0 : i1 to i32
    %c0_i32_0 = arith.constant 0 : i32
    %2 = arith.cmpi ne, %1, %c0_i32_0 : i32
    scf.if %2 {
      %c0_14 = arith.constant 0 : index
      %c0_15 = arith.constant 0 : index
      %18 = vector.load %arg2[%c0_14, %c0_15] : memref<64x16xbf16, #tpu.memory_space<vmem>>, vector<64x16xbf16>
      %19 = arith.extf %18 : vector<64x16xbf16> to vector<64x16xf32>
      %c0_16 = arith.constant 0 : index
      %c0_17 = arith.constant 0 : index
      %20 = vector.load %arg3[%c0_16, %c0_17] : memref<64x16xbf16, #tpu.memory_space<vmem>>, vector<64x16xbf16>
      %21 = arith.extf %20 : vector<64x16xbf16> to vector<64x16xf32>
      %c0_18 = arith.constant 0 : index
      %c0_19 = arith.constant 0 : index
      %22 = vector.load %arg5[%c0_18, %c0_19] : memref<1x16xf32, #tpu.memory_space<vmem>>, vector<1x16xf32>
      %23 = vector.broadcast %22 : vector<1x16xf32> to vector<64x16xf32>
      %24 = arith.mulf %19, %23 : vector<64x16xf32>
      %cst_20 = arith.constant 1.000000e+00 : f32
      %25 = vector.broadcast %cst_20 : f32 to vector<1x16xf32>
      %26 = arith.subf %25, %22 : vector<1x16xf32>
      %27 = vector.broadcast %26 : vector<1x16xf32> to vector<64x16xf32>
      %28 = arith.mulf %21, %27 : vector<64x16xf32>
      %29 = arith.addf %24, %28 : vector<64x16xf32>
      %30 = arith.truncf %29 : vector<64x16xf32> to vector<64x16xbf16>
      %c0_21 = arith.constant 0 : index
      %c0_22 = arith.constant 0 : index
      %31 = vector.load %arg12[%c0_21, %c0_22] : memref<64x16xbf16, #tpu.memory_space<vmem>>, vector<64x16xbf16>
      tpu.vector_store %arg12[%c0_21, %c0_22], %30 {strides = array<i32>} : memref<64x16xbf16, #tpu.memory_space<vmem>>, vector<64x16xbf16>,
      %cst_23 = arith.constant 0.000000e+00 : f32
      %32 = vector.broadcast %cst_23 : f32 to vector<64x16xf32>
      %c0_24 = arith.constant 0 : index
      %c0_25 = arith.constant 0 : index
      %33 = vector.load %arg11[%c0_24, %c0_25] : memref<64x16xf32, #tpu.memory_space<vmem>>, vector<64x16xf32>
      tpu.vector_store %arg11[%c0_24, %c0_25], %32 {strides = array<i32>} : memref<64x16xf32, #tpu.memory_space<vmem>>, vector<64x16xf32>,
    } else {
    }
    %c0 = arith.constant 0 : index
    %c0_1 = arith.constant 0 : index
    %3 = vector.load %arg12[%c0, %c0_1] : memref<64x16xbf16, #tpu.memory_space<vmem>>, vector<64x16xbf16>
    %c0_2 = arith.constant 0 : index
    %c0_3 = arith.constant 0 : index
    %4 = vector.load %arg7[%c0_2, %c0_3] : memref<16x64xbf16, #tpu.memory_space<vmem>>, vector<16x64xbf16>
    %cst = arith.constant dense<0.000000e+00> : vector<64x64xf32>
    %5 = tpu.matmul %3, %4, %cst {dimension_numbers = #tpu.dot_dimension_numbers<[1], [0], [0], [1], [0, 0, 1, 1], [], []>} : vector<64x16xbf16>, vector<16x64xbf16>, vector<64x64xf32> -> vector<64x64xf32>
    %cst_4 = arith.constant 0.000000e+00 : f32
    %6 = vector.broadcast %cst_4 : f32 to vector<64x64xf32>
    %7 = arith.maximumf %5, %6 : vector<64x64xf32>
    %8 = arith.mulf %7, %7 : vector<64x64xf32>
    %9 = arith.truncf %8 : vector<64x64xf32> to vector<64x64xbf16>
    %c0_5 = arith.constant 0 : index
    %c0_6 = arith.constant 0 : index
    %10 = vector.load %arg11[%c0_5, %c0_6] : memref<64x16xf32, #tpu.memory_space<vmem>>, vector<64x16xf32>
    %c0_7 = arith.constant 0 : index
    %c0_8 = arith.constant 0 : index
    %11 = vector.load %arg8[%c0_7, %c0_8] : memref<64x16xbf16, #tpu.memory_space<vmem>>, vector<64x16xbf16>
    %cst_9 = arith.constant dense<0.000000e+00> : vector<64x16xf32>
    %12 = tpu.matmul %9, %11, %cst_9 {dimension_numbers = #tpu.dot_dimension_numbers<[1], [0], [0], [1], [0, 0, 1, 1], [], []>} : vector<64x64xbf16>, vector<64x16xbf16>, vector<64x16xf32> -> vector<64x16xf32>
    %13 = arith.addf %10, %12 : vector<64x16xf32>
    %c0_10 = arith.constant 0 : index
    %c0_11 = arith.constant 0 : index
    %14 = vector.load %arg11[%c0_10, %c0_11] : memref<64x16xf32, #tpu.memory_space<vmem>>, vector<64x16xf32>
    tpu.vector_store %arg11[%c0_10, %c0_11], %13 {strides = array<i32>} : memref<64x16xf32, #tpu.memory_space<vmem>>, vector<64x16xf32>,
    %c0_i32_12 = arith.constant 0 : i32
    %15 = arith.cmpi eq, %arg1, %c0_i32_12 : i32
    %16 = arith.extui %15 : i1 to i32
    %c0_i32_13 = arith.constant 0 : i32
    %17 = arith.cmpi ne, %16, %c0_i32_13 : i32
    scf.if %17 {
      %c0_14 = arith.constant 0 : index
      %c0_15 = arith.constant 0 : index
      %18 = vector.load %arg2[%c0_14, %c0_15] : memref<64x16xbf16, #tpu.memory_space<vmem>>, vector<64x16xbf16>
      %19 = arith.extf %18 : vector<64x16xbf16> to vector<64x16xf32>
      %c0_16 = arith.constant 0 : index
      %c0_17 = arith.constant 0 : index
      %20 = vector.load %arg3[%c0_16, %c0_17] : memref<64x16xbf16, #tpu.memory_space<vmem>>, vector<64x16xbf16>
      %21 = arith.extf %20 : vector<64x16xbf16> to vector<64x16xf32>
      %c0_18 = arith.constant 0 : index
      %c0_19 = arith.constant 0 : index
      %22 = vector.load %arg6[%c0_18, %c0_19] : memref<1x16xf32, #tpu.memory_space<vmem>>, vector<1x16xf32>
      %23 = vector.broadcast %22 : vector<1x16xf32> to vector<64x16xf32>
      %24 = arith.mulf %19, %23 : vector<64x16xf32>
      %cst_20 = arith.constant 1.000000e+00 : f32
      %25 = vector.broadcast %cst_20 : f32 to vector<1x16xf32>
      %26 = arith.subf %25, %22 : vector<1x16xf32>
      %27 = vector.broadcast %26 : vector<1x16xf32> to vector<64x16xf32>
      %28 = arith.mulf %21, %27 : vector<64x16xf32>
      %29 = arith.addf %24, %28 : vector<64x16xf32>
      %30 = arith.truncf %29 : vector<64x16xf32> to vector<64x16xbf16>
      %c0_21 = arith.constant 0 : index
      %c0_22 = arith.constant 0 : index
      %31 = vector.load %arg9[%c0_21, %c0_22] : memref<16x16xbf16, #tpu.memory_space<vmem>>, vector<16x16xbf16>
      %cst_23 = arith.constant dense<0.000000e+00> : vector<64x16xf32>
      %32 = tpu.matmul %30, %31, %cst_23 {dimension_numbers = #tpu.dot_dimension_numbers<[1], [0], [0], [1], [0, 0, 1, 1], [], []>} : vector<64x16xbf16>, vector<16x16xbf16>, vector<64x16xf32> -> vector<64x16xf32>
      %c0_24 = arith.constant 0 : index
      %c0_25 = arith.constant 0 : index
      %33 = vector.load %arg4[%c0_24, %c0_25] : memref<64x16xf32, #tpu.memory_space<vmem>>, vector<64x16xf32>
      %34 = arith.negf %32 : vector<64x16xf32>
      %35 = math.exp %34 : vector<64x16xf32>
      %cst_26 = arith.constant 1.000000e+00 : f32
      %36 = vector.broadcast %cst_26 : f32 to vector<64x16xf32>
      %37 = arith.addf %36, %35 : vector<64x16xf32>
      %38 = arith.divf %36, %37 : vector<64x16xf32>
      %c0_27 = arith.constant 0 : index
      %c0_28 = arith.constant 0 : index
      %39 = vector.load %arg11[%c0_27, %c0_28] : memref<64x16xf32, #tpu.memory_space<vmem>>, vector<64x16xf32>
      %40 = arith.mulf %38, %39 : vector<64x16xf32>
      %41 = arith.addf %33, %40 : vector<64x16xf32>
      %c0_29 = arith.constant 0 : index
      %c0_30 = arith.constant 0 : index
      %42 = vector.load %arg10[%c0_29, %c0_30] : memref<64x16xf32, #tpu.memory_space<vmem>>, vector<64x16xf32>
      tpu.vector_store %arg10[%c0_29, %c0_30], %41 {strides = array<i32>} : memref<64x16xf32, #tpu.memory_space<vmem>>, vector<64x16xf32>,
    } else {
    }
    return
  }
  func.func @transform_0(%arg0: i32, %arg1: i32) -> (i32, i32) {
    %c0_i32 = arith.constant 0 : i32
    %c0_i32_0 = arith.constant 0 : i32
    return %arg0, %c0_i32 : i32, i32
  }
  func.func @transform_1(%arg0: i32, %arg1: i32) -> (i32, i32) {
    %c0_i32 = arith.constant 0 : i32
    %c0_i32_0 = arith.constant 0 : i32
    return %arg0, %c0_i32 : i32, i32
  }
  func.func @transform_2(%arg0: i32, %arg1: i32) -> (i32, i32) {
    %c0_i32 = arith.constant 0 : i32
    %c0_i32_0 = arith.constant 0 : i32
    return %arg0, %c0_i32 : i32, i32
  }
  func.func @transform_3(%arg0: i32, %arg1: i32) -> (i32, i32) {
    %c0_i32 = arith.constant 0 : i32
    %c0_i32_0 = arith.constant 0 : i32
    %c0_i32_1 = arith.constant 0 : i32
    return %c0_i32, %c0_i32_0 : i32, i32
  }
  func.func @transform_4(%arg0: i32, %arg1: i32) -> (i32, i32) {
    %c0_i32 = arith.constant 0 : i32
    %c0_i32_0 = arith.constant 0 : i32
    %c0_i32_1 = arith.constant 0 : i32
    return %c0_i32, %c0_i32_0 : i32, i32
  }
  func.func @transform_5(%arg0: i32, %arg1: i32) -> (i32, i32) {
    %c0_i32 = arith.constant 0 : i32
    %c0_i32_0 = arith.constant 0 : i32
    return %c0_i32, %arg1 : i32, i32
  }
  func.func @transform_6(%arg0: i32, %arg1: i32) -> (i32, i32) {
    %c0_i32 = arith.constant 0 : i32
    %c0_i32_0 = arith.constant 0 : i32
    return %arg1, %c0_i32 : i32, i32
  }
  func.func @transform_7(%arg0: i32, %arg1: i32) -> (i32, i32) {
    %c0_i32 = arith.constant 0 : i32
    %c0_i32_0 = arith.constant 0 : i32
    %c0_i32_1 = arith.constant 0 : i32
    return %c0_i32, %c0_i32_0 : i32, i32
  }
  func.func @transform_8(%arg0: i32, %arg1: i32) -> (i32, i32) {
    %c0_i32 = arith.constant 0 : i32
    %c0_i32_0 = arith.constant 0 : i32
    return %arg0, %c0_i32 : i32, i32
  }
}

</mosaic_0001>

<bundles_post_ra>
// kernel: rwkv_forward.18
= control target key start
LH: loop header
LB: loop body
LE: loop exit
PB: predicated region body
PF: predicated region fallthrough
CT: control target
= control target key end

     0   :  { %vm22_vm0 = vcmask 130048   ;;  %s326_s0 = inlined_call_operand.vmem [shape: f32[64,16], index: 0, kind: input, shape index: {}]   ;;  %s327_s1 = inlined_call_operand.vmem [shape: f32[1,16], index: 1, kind: input, shape index: {}]   ;;  %s328_s2 = inlined_call_operand.vmem [shape: f32[1,16], index: 2, kind: input, shape index: {}]   ;;  %s329_s3 = inlined_call_operand.vmem [shape: f32[64,16], index: 3, kind: output, shape index: {}]  }
   0x1   :  { %v14_v0 = vld [vmem:[%s326_s0] sm:$0xff]  ;;  %v16_v1 = vld [vmem:[%s326_s0 + $0x10] sm:$0xff]  ;;  %v15_v2 = vld [vmem:[%s326_s0 + $0x8] sm:$0xff] }
   0x2   :  { %v23_v3 = vsel %vm22_vm0, %v14_v0, 0.0  ;;  %v29_v4 = vsel %vm22_vm0, %v16_v1, 0.0  ;;  %v17_v5 = vld [vmem:[%s326_s0 + $0x18] sm:$0xff]  ;;  %v26_v6 = vsel %vm22_vm0, %v15_v2, 0.0  ;;  %v18_v8 = vld [vmem:[%s326_s0 + $0x20] sm:$0xff]  ;;  %v19_v9 = vld [vmem:[%s326_s0 + $0x28] sm:$0xff] }
   0x3   :  { %24 = vadd.xlane.f32.xlu0 %v23_v3  ;;  %30 = vadd.xlane.f32.xlu1 %v29_v4  ;;  %v32_v7 = vsel %vm22_vm0, %v17_v5, 0.0  ;;  %v35_v10 = vsel %vm22_vm0, %v18_v8, 0.0  ;;  %v38_v11 = vsel %vm22_vm0, %v19_v9, 0.0  ;;  %v20_v12 = vld [vmem:[%s326_s0 + $0x30] sm:$0xff]  ;;  %v21_v13 = vld [vmem:[%s326_s0 + $0x38] sm:$0xff] }
   0x4   :  { %v41_v14 = vsel %vm22_vm0, %v20_v12, 0.0  ;;  %v44_v15 = vsel %vm22_vm0, %v21_v13, 0.0 }
   0x7   :  { %27 = vadd.xlane.f32.xlu0 %v26_v6  ;;  %33 = vadd.xlane.f32.xlu1 %v32_v7 }
   0xb   :  { %36 = vadd.xlane.f32.xlu0 %v35_v10  ;;  %39 = vadd.xlane.f32.xlu1 %v38_v11 }
   0xf   :  { %42 = vadd.xlane.f32.xlu0 %v41_v14  ;;  %45 = vadd.xlane.f32.xlu1 %v44_v15 }
  0x90   :  { %v25_v16 = vpop.xlane.xlu0 %24  ;;  %v31_v17 = vpop.xlane.xlu1 %30 }
  0x91   :  { %v48_v18 = vmul.f32 0.0625, %v25_v16  ;;  %v50_v19 = vmul.f32 0.0625, %v31_v17  ;;  %v171_v17 = vld [vmem:[%s328_s2] ss:$0 sm:$0xff] }
  0x93   :  { %v240_v20 = vsub.f32 %v14_v0, %v48_v18  ;;  %v242_v21 = vsub.f32 %v16_v1, %v50_v19 }
  0x94   :  { %v28_v22 = vpop.xlane.xlu0 %27  ;;  %v34_v23 = vpop.xlane.xlu1 %33 }
  0x95   :  { %v49_v24 = vmul.f32 0.0625, %v28_v22  ;;  %v51_v25 = vmul.f32 0.0625, %v34_v23  ;;  %v64_v26 = vmul.f32 %v240_v20, %v240_v20  ;;  %v66_v27 = vmul.f32 %v242_v21, %v242_v21 }
  0x97   :  { %v248_v28 = vsub.f32 %v15_v2, %v49_v24  ;;  %v250_v29 = vsub.f32 %v17_v5, %v51_v25  ;;  %v72_v30 = vsel %vm22_vm0, %v64_v26, 0.0  ;;  %v78_v33 = vsel %vm22_vm0, %v66_v27, 0.0 }
  0x98   :  { %73 = vadd.xlane.f32.xlu0 %v72_v30  ;;  %v37_v31 = vpop.xlane.xlu0 %36  ;;  %v40_v32 = vpop.xlane.xlu1 %39 }
  0x99   :  { %v52_v34 = vmul.f32 0.0625, %v37_v31  ;;  %v53_v35 = vmul.f32 0.0625, %v40_v32  ;;  %v65_v36 = vmul.f32 %v248_v28, %v248_v28  ;;  %v67_v37 = vmul.f32 %v250_v29, %v250_v29 }
  0x9b   :  { %v258_v38 = vsub.f32 %v18_v8, %v52_v34  ;;  %v260_v39 = vsub.f32 %v19_v9, %v53_v35  ;;  %v75_v40 = vsel %vm22_vm0, %v65_v36, 0.0  ;;  %v81_v43 = vsel %vm22_vm0, %v67_v37, 0.0 }
  0x9c   :  { %79 = vadd.xlane.f32.xlu0 %v78_v33  ;;  %76 = vadd.xlane.f32.xlu1 %v75_v40  ;;  %v43_v41 = vpop.xlane.xlu0 %42  ;;  %v46_v42 = vpop.xlane.xlu1 %45 }
  0x9d   :  { %v54_v44 = vmul.f32 0.0625, %v43_v41  ;;  %v55_v45 = vmul.f32 0.0625, %v46_v42  ;;  %v68_v46 = vmul.f32 %v258_v38, %v258_v38  ;;  %v69_v47 = vmul.f32 %v260_v39, %v260_v39 }
  0x9f   :  { %v268_v48 = vsub.f32 %v20_v12, %v54_v44  ;;  %v270_v49 = vsub.f32 %v21_v13, %v55_v45  ;;  %v84_v50 = vsel %vm22_vm0, %v68_v46, 0.0  ;;  %v87_v51 = vsel %vm22_vm0, %v69_v47, 0.0  ;;  %v170_v12 = vld [vmem:[%s327_s1] ss:$0 sm:$0xff] }
  0xa0   :  { %82 = vadd.xlane.f32.xlu1 %v81_v43  ;;  %85 = vadd.xlane.f32.xlu0 %v84_v50 }
  0xa1   :  { %v70_v52 = vmul.f32 %v268_v48, %v268_v48  ;;  %v71_v53 = vmul.f32 %v270_v49, %v270_v49 }
  0xa3   :  { %v90_v54 = vsel %vm22_vm0, %v70_v52, 0.0  ;;  %v93_v55 = vsel %vm22_vm0, %v71_v53, 0.0 }
  0xa4   :  { %88 = vadd.xlane.f32.xlu1 %v87_v51  ;;  %91 = vadd.xlane.f32.xlu0 %v90_v54 }
  0xa8   :  { %94 = vadd.xlane.f32.xlu1 %v93_v55 }
 0x125   :  { %v74_v56 = vpop.xlane.xlu0 %73 }
 0x126   :  { %v96_v57 = vmul.f32 0.0625, %v74_v56 }
 0x128   :  { %v104_v58 = vadd.f32 1e-05, %v96_v57 }
 0x129   :  { %v77_v59 = vpop.xlane.xlu1 %76  ;;  %v80_v60 = vpop.xlane.xlu0 %79 }
 0x12a   :  { %172 = vrsqrt.f32 %v104_v58  ;;  %v97_v61 = vmul.f32 0.0625, %v77_v59  ;;  %v98_v62 = vmul.f32 0.0625, %v80_v60 }
 0x12c   :  { %v105_v63 = vadd.f32 1e-05, %v97_v61  ;;  %v106_v0 = vadd.f32 1e-05, %v98_v62 }
 0x12d   :  { %v83_v1 = vpop.xlane.xlu1 %82  ;;  %v86_v2 = vpop.xlane.xlu0 %85 }
 0x12e   :  { %174 = vrsqrt.f32 %v105_v63  ;;  %v99_v3 = vmul.f32 0.0625, %v83_v1  ;;  %v100_v4 = vmul.f32 0.0625, %v86_v2 }
 0x12f   :  { %176 = vrsqrt.f32 %v106_v0 }
 0x130   :  { %v107_v5 = vadd.f32 1e-05, %v99_v3  ;;  %v108_v6 = vadd.f32 1e-05, %v100_v4 }
 0x131   :  { %v89_v7 = vpop.xlane.xlu1 %88  ;;  %v92_v8 = vpop.xlane.xlu0 %91 }
 0x132   :  { %178 = vrsqrt.f32 %v107_v5  ;;  %v101_v9 = vmul.f32 0.0625, %v89_v7  ;;  %v102_v10 = vmul.f32 0.0625, %v92_v8 }
 0x133   :  { %180 = vrsqrt.f32 %v108_v6 }
 0x134   :  { %v173_v11 = vpop.eup %172  ;;  %v109_v13 = vadd.f32 1e-05, %v101_v9  ;;  %v110_v14 = vadd.f32 1e-05, %v102_v10 }
 0x135   :  { %v120_v15 = vmul.f32 %v173_v11, %v240_v20  ;;  %v95_v16 = vpop.xlane.xlu1 %94 }
 0x136   :  { %182 = vrsqrt.f32 %v109_v13  ;;  %v103_v18 = vmul.f32 0.0625, %v95_v16 }
 0x137   :  { %v135_v19 = vmul.f32 %v170_v12, %v120_v15  ;;  %184 = vrsqrt.f32 %v110_v14 }
 0x138   :  { %v175_v22 = vpop.eup %174  ;;  %v111_v23 = vadd.f32 1e-05, %v103_v18 }
 0x139   :  { %v177_v24 = vpop.eup %176  ;;  %v150_v25 = vadd.f32 %v171_v17, %v135_v19  ;;  %v121_v26 = vmul.f32 %v175_v22, %v248_v28 }
 0x13a   :  { %v122_v27 = vmul.f32 %v177_v24, %v242_v21  ;;  %186 = vrsqrt.f32 %v111_v23 }
 0x13b   :  { %158 = vst.msk [vmem:[%s329_s3] sm:$0xff] %vm22_vm0, %v150_v25  ;;  %v136_v20 = vmul.f32 %v170_v12, %v121_v26 }
 0x13c   :  { %v179_v30 = vpop.eup %178  ;;  %v137_v31 = vmul.f32 %v170_v12, %v122_v27 }
 0x13d   :  { %v181_v32 = vpop.eup %180  ;;  %v151_v33 = vadd.f32 %v171_v17, %v136_v20  ;;  %v123_v34 = vmul.f32 %v179_v30, %v250_v29 }
 0x13e   :  { %v152_v35 = vadd.f32 %v171_v17, %v137_v31  ;;  %v124_v36 = vmul.f32 %v181_v32, %v258_v38 }
 0x13f   :  { %159 = vst.msk [vmem:[%s329_s3 + $0x8] sm:$0xff] %vm22_vm0, %v151_v33  ;;  %v138_v21 = vmul.f32 %v170_v12, %v123_v34 }
 0x140   :  { %v183_v28 = vpop.eup %182  ;;  %160 = vst.msk [vmem:[%s329_s3 + $0x10] sm:$0xff] %vm22_vm0, %v152_v35  ;;  %v139_v37 = vmul.f32 %v170_v12, %v124_v36 }
 0x141   :  { %v185_v40 = vpop.eup %184  ;;  %v153_v41 = vadd.f32 %v171_v17, %v138_v21  ;;  %v125_v29 = vmul.f32 %v183_v28, %v260_v39 }
 0x142   :  { %v154_v42 = vadd.f32 %v171_v17, %v139_v37  ;;  %v126_v38 = vmul.f32 %v185_v40, %v268_v48 }
 0x143   :  { %161 = vst.msk [vmem:[%s329_s3 + $0x18] sm:$0xff] %vm22_vm0, %v153_v41  ;;  %v140_v43 = vmul.f32 %v170_v12, %v125_v29 }
 0x144   :  { %v187_v44 = vpop.eup %186  ;;  %162 = vst.msk [vmem:[%s329_s3 + $0x20] sm:$0xff] %vm22_vm0, %v154_v42  ;;  %v141_v45 = vmul.f32 %v170_v12, %v126_v38 }
 0x145   :  { %v155_v46 = vadd.f32 %v171_v17, %v140_v43  ;;  %v127_v47 = vmul.f32 %v187_v44, %v270_v49 }
 0x146   :  { %v156_v39 = vadd.f32 %v171_v17, %v141_v45 }
 0x147   :  { %163 = vst.msk [vmem:[%s329_s3 + $0x28] sm:$0xff] %vm22_vm0, %v155_v46  ;;  %v142_v48 = vmul.f32 %v170_v12, %v127_v47 }
 0x148   :  { %164 = vst.msk [vmem:[%s329_s3 + $0x30] sm:$0xff] %vm22_vm0, %v156_v39 }
 0x149   :  { %v157_v50 = vadd.f32 %v171_v17, %v142_v48 }
 0x14b   :  { %165 = vst.msk [vmem:[%s329_s3 + $0x38] sm:$0xff] %vm22_vm0, %v157_v50 }

// kernel: rwkv_forward.19
= control target key start
LH: loop header
LB: loop body
LE: loop exit
PB: predicated region body
PF: predicated region fallthrough
CT: control target
= control target key end

     0   :  { %vm22_vm0 = vcmask 130048   ;;  %vm190_vm1 = vcmask 125952   ;;  %s375_s0 = inlined_call_operand.vmem [shape: f32[64,16], index: 0, kind: input, shape index: {}]   ;;  %s376_s1 = inlined_call_operand.vmem [shape: f32[1,16], index: 1, kind: input, shape index: {}]   ;;  %s377_s2 = inlined_call_operand.vmem [shape: f32[1,16], index: 2, kind: input, shape index: {}]   ;;  %s378_s3 = inlined_call_operand.vmem [shape: bf16[64,16], index: 3, kind: output, shape index: {}]  }
   0x1   :  { %v14_v0 = vld [vmem:[%s375_s0] sm:$0xff]  ;;  %v16_v1 = vld [vmem:[%s375_s0 + $0x10] sm:$0xff]  ;;  %v15_v2 = vld [vmem:[%s375_s0 + $0x8] sm:$0xff] }
   0x2   :  { %v23_v3 = vsel %vm22_vm0, %v14_v0, 0.0  ;;  %v29_v4 = vsel %vm22_vm0, %v16_v1, 0.0  ;;  %v17_v5 = vld [vmem:[%s375_s0 + $0x18] sm:$0xff]  ;;  %v26_v6 = vsel %vm22_vm0, %v15_v2, 0.0  ;;  %v18_v8 = vld [vmem:[%s375_s0 + $0x20] sm:$0xff]  ;;  %v19_v9 = vld [vmem:[%s375_s0 + $0x28] sm:$0xff] }
   0x3   :  { %24 = vadd.xlane.f32.xlu0 %v23_v3  ;;  %30 = vadd.xlane.f32.xlu1 %v29_v4  ;;  %v32_v7 = vsel %vm22_vm0, %v17_v5, 0.0  ;;  %v35_v10 = vsel %vm22_vm0, %v18_v8, 0.0  ;;  %v38_v11 = vsel %vm22_vm0, %v19_v9, 0.0  ;;  %v20_v12 = vld [vmem:[%s375_s0 + $0x30] sm:$0xff]  ;;  %v21_v13 = vld [vmem:[%s375_s0 + $0x38] sm:$0xff] }
   0x4   :  { %v41_v14 = vsel %vm22_vm0, %v20_v12, 0.0  ;;  %v44_v15 = vsel %vm22_vm0, %v21_v13, 0.0 }
   0x7   :  { %27 = vadd.xlane.f32.xlu0 %v26_v6  ;;  %33 = vadd.xlane.f32.xlu1 %v32_v7 }
   0xb   :  { %36 = vadd.xlane.f32.xlu0 %v35_v10  ;;  %39 = vadd.xlane.f32.xlu1 %v38_v11 }
   0xf   :  { %42 = vadd.xlane.f32.xlu0 %v41_v14  ;;  %45 = vadd.xlane.f32.xlu1 %v44_v15 }
  0x90   :  { %v25_v16 = vpop.xlane.xlu0 %24  ;;  %v31_v17 = vpop.xlane.xlu1 %30 }
  0x91   :  { %v48_v18 = vmul.f32 0.0625, %v25_v16  ;;  %v50_v19 = vmul.f32 0.0625, %v31_v17  ;;  %v204_v17 = vld [vmem:[%s377_s2] ss:$0 sm:$0xff] }
  0x93   :  { %v289_v20 = vsub.f32 %v14_v0, %v48_v18  ;;  %v291_v21 = vsub.f32 %v16_v1, %v50_v19 }
  0x94   :  { %v28_v22 = vpop.xlane.xlu0 %27  ;;  %v34_v23 = vpop.xlane.xlu1 %33 }
  0x95   :  { %v49_v24 = vmul.f32 0.0625, %v28_v22  ;;  %v51_v25 = vmul.f32 0.0625, %v34_v23  ;;  %v64_v26 = vmul.f32 %v289_v20, %v289_v20  ;;  %v66_v27 = vmul.f32 %v291_v21, %v291_v21 }
  0x97   :  { %v297_v28 = vsub.f32 %v15_v2, %v49_v24  ;;  %v299_v29 = vsub.f32 %v17_v5, %v51_v25  ;;  %v72_v30 = vsel %vm22_vm0, %v64_v26, 0.0  ;;  %v78_v33 = vsel %vm22_vm0, %v66_v27, 0.0 }
  0x98   :  { %73 = vadd.xlane.f32.xlu0 %v72_v30  ;;  %v37_v31 = vpop.xlane.xlu0 %36  ;;  %v40_v32 = vpop.xlane.xlu1 %39 }
  0x99   :  { %v52_v34 = vmul.f32 0.0625, %v37_v31  ;;  %v53_v35 = vmul.f32 0.0625, %v40_v32  ;;  %v65_v36 = vmul.f32 %v297_v28, %v297_v28  ;;  %v67_v37 = vmul.f32 %v299_v29, %v299_v29 }
  0x9b   :  { %v307_v38 = vsub.f32 %v18_v8, %v52_v34  ;;  %v309_v39 = vsub.f32 %v19_v9, %v53_v35  ;;  %v75_v40 = vsel %vm22_vm0, %v65_v36, 0.0  ;;  %v81_v43 = vsel %vm22_vm0, %v67_v37, 0.0 }
  0x9c   :  { %79 = vadd.xlane.f32.xlu0 %v78_v33  ;;  %76 = vadd.xlane.f32.xlu1 %v75_v40  ;;  %v43_v41 = vpop.xlane.xlu0 %42  ;;  %v46_v42 = vpop.xlane.xlu1 %45 }
  0x9d   :  { %v54_v44 = vmul.f32 0.0625, %v43_v41  ;;  %v55_v45 = vmul.f32 0.0625, %v46_v42  ;;  %v68_v46 = vmul.f32 %v307_v38, %v307_v38  ;;  %v69_v47 = vmul.f32 %v309_v39, %v309_v39 }
  0x9f   :  { %v317_v48 = vsub.f32 %v20_v12, %v54_v44  ;;  %v319_v49 = vsub.f32 %v21_v13, %v55_v45  ;;  %v84_v50 = vsel %vm22_vm0, %v68_v46, 0.0  ;;  %v87_v51 = vsel %vm22_vm0, %v69_v47, 0.0  ;;  %v203_v12 = vld [vmem:[%s376_s1] ss:$0 sm:$0xff] }
  0xa0   :  { %82 = vadd.xlane.f32.xlu1 %v81_v43  ;;  %85 = vadd.xlane.f32.xlu0 %v84_v50 }
  0xa1   :  { %v70_v52 = vmul.f32 %v317_v48, %v317_v48  ;;  %v71_v53 = vmul.f32 %v319_v49, %v319_v49 }
  0xa3   :  { %v90_v54 = vsel %vm22_vm0, %v70_v52, 0.0  ;;  %v93_v55 = vsel %vm22_vm0, %v71_v53, 0.0 }
  0xa4   :  { %88 = vadd.xlane.f32.xlu1 %v87_v51  ;;  %91 = vadd.xlane.f32.xlu0 %v90_v54 }
  0xa8   :  { %94 = vadd.xlane.f32.xlu1 %v93_v55 }
 0x125   :  { %v74_v56 = vpop.xlane.xlu0 %73 }
 0x126   :  { %v96_v57 = vmul.f32 0.0625, %v74_v56 }
 0x128   :  { %v104_v58 = vadd.f32 1e-05, %v96_v57 }
 0x129   :  { %v77_v59 = vpop.xlane.xlu1 %76  ;;  %v80_v60 = vpop.xlane.xlu0 %79 }
 0x12a   :  { %221 = vrsqrt.f32 %v104_v58  ;;  %v97_v61 = vmul.f32 0.0625, %v77_v59  ;;  %v98_v62 = vmul.f32 0.0625, %v80_v60 }
 0x12c   :  { %v105_v63 = vadd.f32 1e-05, %v97_v61  ;;  %v106_v0 = vadd.f32 1e-05, %v98_v62 }
 0x12d   :  { %v83_v1 = vpop.xlane.xlu1 %82  ;;  %v86_v2 = vpop.xlane.xlu0 %85 }
 0x12e   :  { %223 = vrsqrt.f32 %v105_v63  ;;  %v99_v3 = vmul.f32 0.0625, %v83_v1  ;;  %v100_v4 = vmul.f32 0.0625, %v86_v2 }
 0x12f   :  { %225 = vrsqrt.f32 %v106_v0 }
 0x130   :  { %v107_v5 = vadd.f32 1e-05, %v99_v3  ;;  %v108_v6 = vadd.f32 1e-05, %v100_v4 }
 0x131   :  { %v89_v7 = vpop.xlane.xlu1 %88  ;;  %v92_v8 = vpop.xlane.xlu0 %91 }
 0x132   :  { %227 = vrsqrt.f32 %v107_v5  ;;  %v101_v9 = vmul.f32 0.0625, %v89_v7  ;;  %v102_v10 = vmul.f32 0.0625, %v92_v8 }
 0x133   :  { %229 = vrsqrt.f32 %v108_v6 }
 0x134   :  { %v222_v11 = vpop.eup %221  ;;  %v109_v13 = vadd.f32 1e-05, %v101_v9  ;;  %v110_v14 = vadd.f32 1e-05, %v102_v10 }
 0x135   :  { %v120_v15 = vmul.f32 %v222_v11, %v289_v20  ;;  %v95_v16 = vpop.xlane.xlu1 %94 }
 0x136   :  { %231 = vrsqrt.f32 %v109_v13  ;;  %v103_v18 = vmul.f32 0.0625, %v95_v16 }
 0x137   :  { %v135_v19 = vmul.f32 %v203_v12, %v120_v15  ;;  %233 = vrsqrt.f32 %v110_v14 }
 0x138   :  { %v224_v22 = vpop.eup %223  ;;  %v111_v23 = vadd.f32 1e-05, %v103_v18 }
 0x139   :  { %v226_v24 = vpop.eup %225  ;;  %v150_v25 = vadd.f32 %v204_v17, %v135_v19  ;;  %v121_v26 = vmul.f32 %v224_v22, %v297_v28 }
 0x13a   :  { %v122_v27 = vmul.f32 %v226_v24, %v291_v21  ;;  %235 = vrsqrt.f32 %v111_v23 }
 0x13b   :  { %v213_v20 = vpack.c.bf16 %v150_v25, %v150_v25  ;;  %v136_v30 = vmul.f32 %v203_v12, %v121_v26 }
 0x13c   :  { %v228_v31 = vpop.eup %227  ;;  %v137_v32 = vmul.f32 %v203_v12, %v122_v27 }
 0x13d   :  { %v230_v33 = vpop.eup %229  ;;  %191 = vst.msk [vmem:[%s378_s3] sm:$0xf] %vm190_vm1, %v213_v20  ;;  %v151_v34 = vadd.f32 %v204_v17, %v136_v30  ;;  %v123_v35 = vmul.f32 %v228_v31, %v299_v29 }
 0x13e   :  { %v152_v36 = vadd.f32 %v204_v17, %v137_v32  ;;  %v124_v28 = vmul.f32 %v230_v33, %v307_v38 }
 0x13f   :  { %v214_v37 = vpack.c.bf16 %v151_v34, %v151_v34  ;;  %v138_v40 = vmul.f32 %v203_v12, %v123_v35 }
 0x140   :  { %v232_v21 = vpop.eup %231  ;;  %v215_v41 = vpack.c.bf16 %v152_v36, %v152_v36  ;;  %v139_v42 = vmul.f32 %v203_v12, %v124_v28 }
 0x141   :  { %v234_v43 = vpop.eup %233  ;;  %192 = vst.msk [vmem:[%s378_s3 + $0x4] sm:$0xf] %vm190_vm1, %v214_v37  ;;  %v153_v44 = vadd.f32 %v204_v17, %v138_v40  ;;  %v125_v45 = vmul.f32 %v232_v21, %v309_v39 }
 0x142   :  { %193 = vst.msk [vmem:[%s378_s3 + $0x8] sm:$0xf] %vm190_vm1, %v215_v41  ;;  %v154_v29 = vadd.f32 %v204_v17, %v139_v42  ;;  %v126_v38 = vmul.f32 %v234_v43, %v317_v48 }
 0x143   :  { %v216_v46 = vpack.c.bf16 %v153_v44, %v153_v44  ;;  %v140_v47 = vmul.f32 %v203_v12, %v125_v45 }
 0x144   :  { %v236_v50 = vpop.eup %235  ;;  %v217_v51 = vpack.c.bf16 %v154_v29, %v154_v29  ;;  %v141_v52 = vmul.f32 %v203_v12, %v126_v38 }
 0x145   :  { %194 = vst.msk [vmem:[%s378_s3 + $0xc] sm:$0xf] %vm190_vm1, %v216_v46  ;;  %v155_v53 = vadd.f32 %v204_v17, %v140_v47  ;;  %v127_v39 = vmul.f32 %v236_v50, %v319_v49 }
 0x146   :  { %195 = vst.msk [vmem:[%s378_s3 + $0x10] sm:$0xf] %vm190_vm1, %v217_v51  ;;  %v156_v54 = vadd.f32 %v204_v17, %v141_v52 }
 0x147   :  { %v218_v48 = vpack.c.bf16 %v155_v53, %v155_v53  ;;  %v142_v55 = vmul.f32 %v203_v12, %v127_v39 }
 0x148   :  { %v219_v56 = vpack.c.bf16 %v156_v54, %v156_v54 }
 0x149   :  { %196 = vst.msk [vmem:[%s378_s3 + $0x14] sm:$0xf] %vm190_vm1, %v218_v48  ;;  %v157_v57 = vadd.f32 %v204_v17, %v142_v55 }
 0x14a   :  { %197 = vst.msk [vmem:[%s378_s3 + $0x18] sm:$0xf] %vm190_vm1, %v219_v56 }
 0x14b   :  { %v220_v49 = vpack.c.bf16 %v157_v57, %v157_v57 }
 0x14d   :  { %198 = vst.msk [vmem:[%s378_s3 + $0x1c] sm:$0xf] %vm190_vm1, %v220_v49 }

// kernel: rwkv_forward.20
= control target key start
LH: loop header
LB: loop body
LE: loop exit
PB: predicated region body
PF: predicated region fallthrough
CT: control target
= control target key end

     0   :  { %v69_v0 = vlaneseq  ;;  %vm199_vm0 = vcmask 130048   ;;  %vm309_vm1 = vcmask 125952   ;;  %s1130_s5 = inlined_call_operand.vmem [shape: bf16[16,16], index: 5, kind: input, shape index: {}]   ;;  %s1131_s0 = inlined_call_operand.vmem [shape: bf16[64,16], index: 0, kind: input, shape index: {}]   ;;  %s1132_s1 = inlined_call_operand.vmem [shape: bf16[64,16], index: 1, kind: input, shape index: {}]   ;;  %s1133_s2 = inlined_call_operand.vmem [shape: f32[1,16], index: 2, kind: input, shape index: {}]   ;;  %s1134_s7 = inlined_call_operand.vmem [shape: bf16[16,16], index: 7, kind: input, shape index: {}]   ;;  %s1135_s4 = inlined_call_operand.vmem [shape: f32[1,16], index: 4, kind: input, shape index: {}]   ;;  %s1136_s6 = inlined_call_operand.vmem [shape: bf16[16,16], index: 6, kind: input, shape index: {}]   ;;  %s1137_s3 = inlined_call_operand.vmem [shape: f32[1,16], index: 3, kind: input, shape index: {}]   ;;  %s1138_s8 = inlined_call_operand.vmem [shape: bf16[64,16], index: 8, kind: output, shape index: {0}]   ;;  %s1139_s9 = inlined_call_operand.vmem [shape: bf16[64,16], index: 9, kind: output, shape index: {1}]   ;;  %s1140_s10 = inlined_call_operand.vmem [shape: bf16[64,16], index: 10, kind: output, shape index: {2}]  }
   0x1   :  { %v784_v1 = vld [vmem:[%s1130_s5] sm:$0xff]   ;;  %v731_v13 = vld [vmem:[%s1131_s0 + $0x8] sm:$0xff]   ;;  %v732_v20 = vld [vmem:[%s1131_s0 + $0x10] sm:$0xff]  }
   0x2   :  { %v700_v2 = vld [vmem:[%s1131_s0] sm:$0xff]   ;;  %v70_v5 = vshrl.u32 %v69_v0, 7  ;;  %752 = vmatprep.subr.bf16.mxu0 %v784_v1  ;;  %782 = vmatprep.subr.bf16.mxu1 %v784_v1  ;;  %v734_v14 = vld [vmem:[%s1132_s1 + $0x8] sm:$0xff]   ;;  %v911_v16 = vunpack.c.l.bf16 %v731_v13  ;;  %v913_v17 = vunpack.c.h.bf16 %v731_v13  ;;  %v735_v21 = vld [vmem:[%s1132_s1 + $0x10] sm:$0xff]   ;;  %v932_v26 = vunpack.c.l.bf16 %v732_v20 }
   0x3   :  { %v716_v3 = vld [vmem:[%s1132_s1] sm:$0xff]   ;;  %v886_v6 = vunpack.c.l.bf16 %v700_v2  ;;  %v888_v7 = vunpack.c.h.bf16 %v700_v2  ;;  %753 = vmatpush3.bf16.msra.mxu0 %v784_v1  ;;  %783 = vmatpush3.bf16.msra.mxu1 %v784_v1  ;;  %v915_v18 = vunpack.c.l.bf16 %v734_v14  ;;  %v917_v19 = vunpack.c.h.bf16 %v734_v14  ;;  %v733_v47 = vld [vmem:[%s1131_s0 + $0x18] sm:$0xff]  }
   0x4   :  { %v65_v4 = vld [vmem:[%s1133_s2] sm:$0x1]  ;;  %v895_v9 = vunpack.c.l.bf16 %v716_v3  ;;  %v897_v10 = vunpack.c.h.bf16 %v716_v3  ;;  %v899_v11 = vsub.s32 0, %v70_v5  ;;  %v934_v27 = vunpack.c.h.bf16 %v732_v20  ;;  %v736_v56 = vld [vmem:[%s1132_s1 + $0x18] sm:$0xff]  }
   0x5   :  { %v893_v8 = vld [vmem:[%s1134_s7] sm:$0xff]   ;;  %v82_v12 = vsub.f32 1.0, %v65_v4  ;;  %v936_v28 = vunpack.c.l.bf16 %v735_v21  ;;  %v938_v29 = vunpack.c.h.bf16 %v735_v21  ;;  %v982_v60 = vunpack.c.l.bf16 %v733_v47 }
   0x6   :  { %v67_v15 = vld [vmem:[%s1135_s4] sm:$0x1]  ;;  %772 = vmatprep.subr.bf16.mxu0 %v893_v8  ;;  %v926_v22 = vrot.slane %v65_v4, %v899_v11  ;;  %v985_v0 = vunpack.c.h.bf16 %v733_v47  ;;  %v729_v4 = vunpack.c.l.bf16 %v736_v56 }
   0x7   :  { %v929_v23 = vrot.slane %v82_v12, %v899_v11  ;;  %v154_v24 = vrot.slane %v67_v15, %v899_v11  ;;  %v164_v25 = vsub.f32 1.0, %v67_v15  ;;  %v943_v30 = vld [vmem:[%s1136_s6] sm:$0xff]   ;;  %v730_v12 = vunpack.c.h.bf16 %v736_v56 }
   0x8   :  { %v74_v31 = vmul.f32 %v886_v6, %v926_v22  ;;  %v75_v32 = vmul.f32 %v888_v7, %v926_v22  ;;  %v76_v35 = vmul.f32 %v911_v16, %v926_v22  ;;  %v77_v36 = vmul.f32 %v913_v17, %v926_v22  ;;  %762 = vmatprep.subr.bf16.mxu1 %v943_v30 }
   0x9   :  { %v89_v33 = vmul.f32 %v895_v9, %v929_v23  ;;  %v90_v34 = vmul.f32 %v897_v10, %v929_v23  ;;  %v91_v37 = vmul.f32 %v915_v18, %v929_v23  ;;  %v92_v38 = vmul.f32 %v917_v19, %v929_v23 }
   0xa   :  { %v156_v41 = vmul.f32 %v886_v6, %v154_v24  ;;  %v157_v42 = vmul.f32 %v888_v7, %v154_v24  ;;  %v169_v45 = vrot.slane %v164_v25, %v899_v11  ;;  %v158_v46 = vmul.f32 %v911_v16, %v154_v24 }
   0xb   :  { %v97_v39 = vadd.f32 %v89_v33, %v74_v31  ;;  %v98_v40 = vadd.f32 %v90_v34, %v75_v32  ;;  %v99_v43 = vadd.f32 %v91_v37, %v76_v35  ;;  %v100_v44 = vadd.f32 %v92_v38, %v77_v36 }
   0xc   :  { %v159_v49 = vmul.f32 %v913_v17, %v154_v24  ;;  %v160_v50 = vmul.f32 %v932_v26, %v154_v24  ;;  %v161_v51 = vmul.f32 %v934_v27, %v154_v24  ;;  %v171_v53 = vmul.f32 %v895_v9, %v169_v45 }
   0xd   :  { %v105_v48 = vpack.c.bf16 %v98_v40, %v97_v39  ;;  %v106_v52 = vpack.c.bf16 %v100_v44, %v99_v43  ;;  %v172_v54 = vmul.f32 %v897_v10, %v169_v45  ;;  %v173_v55 = vmul.f32 %v915_v18, %v169_v45 }
   0xe   :  { %v174_v57 = vmul.f32 %v917_v19, %v169_v45  ;;  %v175_v58 = vmul.f32 %v936_v28, %v169_v45  ;;  %v176_v59 = vmul.f32 %v938_v29, %v169_v45  ;;  %v179_v61 = vadd.f32 %v171_v53, %v156_v41 }
   0xf   :  { %754 = vmatprep.mubr.msk.bf16.mxu0 %vm199_vm0, %v105_v48  ;;  %v180_v62 = vadd.f32 %v172_v54, %v157_v42  ;;  %v181_v63 = vadd.f32 %v173_v55, %v158_v46  ;;  %v162_v13 = vmul.f32 %v982_v60, %v154_v24  ;;  %v163_v15 = vmul.f32 %v985_v0, %v154_v24  ;;  %v66_v24 = vld [vmem:[%s1137_s3] sm:$0x1] }
  0x10   :  { %755 = vmatmul.mubr.msk.bf16.vlgmr.msra.gmra.mrb[0].mxu0 %vm199_vm0, %v106_v52  ;;  %v182_v1 = vadd.f32 %v174_v57, %v159_v49  ;;  %v183_v2 = vadd.f32 %v175_v58, %v160_v50  ;;  %v184_v3 = vadd.f32 %v176_v59, %v161_v51  ;;  %v177_v20 = vmul.f32 %v729_v4, %v169_v45 }
  0x11   :  { %773 = vmatpush3.bf16.msra.mxu0 %v893_v8  ;;  %v187_v5 = vpack.c.bf16 %v180_v62, %v179_v61  ;;  %v78_v21 = vmul.f32 %v932_v26, %v926_v22  ;;  %v178_v25 = vmul.f32 %v730_v12, %v169_v45  ;;  %v79_v8 = vmul.f32 %v934_v27, %v926_v22 }
  0x12   :  { %v188_v14 = vpack.c.bf16 %v182_v1, %v181_v63  ;;  %v93_v31 = vmul.f32 %v936_v28, %v929_v23  ;;  %v94_v32 = vmul.f32 %v938_v29, %v929_v23  ;;  %v189_v33 = vpack.c.bf16 %v184_v3, %v183_v2 }
  0x13   :  { %774 = vmatprep.mubr.msk.bf16.mxu0 %vm199_vm0, %v187_v5  ;;  %v80_v34 = vmul.f32 %v982_v60, %v926_v22  ;;  %v81_v35 = vmul.f32 %v985_v0, %v926_v22  ;;  %v95_v36 = vmul.f32 %v729_v4, %v929_v23  ;;  %v96_v39 = vmul.f32 %v730_v12, %v929_v23 }
  0x14   :  { %v101_v37 = vadd.f32 %v93_v31, %v78_v21  ;;  %v102_v38 = vadd.f32 %v94_v32, %v79_v8  ;;  %v113_v41 = vrot.slane %v66_v24, %v899_v11  ;;  %v123_v42 = vsub.f32 1.0, %v66_v24 }
  0x15   :  { %v103_v40 = vadd.f32 %v95_v36, %v80_v34  ;;  %v185_v43 = vadd.f32 %v177_v20, %v162_v13  ;;  %v186_v44 = vadd.f32 %v178_v25, %v163_v15  ;;  %v104_v46 = vadd.f32 %v96_v39, %v81_v35 }
  0x16   :  { %v107_v45 = vpack.c.bf16 %v102_v38, %v101_v37  ;;  %v115_v22 = vmul.f32 %v886_v6, %v113_v41  ;;  %v116_v47 = vmul.f32 %v888_v7, %v113_v41  ;;  %v128_v48 = vrot.slane %v123_v42, %v899_v11 }
  0x17   :  { %v117_v23 = vmul.f32 %v911_v16, %v113_v41  ;;  %v108_v49 = vpack.c.bf16 %v104_v46, %v103_v40  ;;  %v118_v50 = vmul.f32 %v913_v17, %v113_v41  ;;  %v119_v51 = vmul.f32 %v932_v26, %v113_v41 }
  0x18   :  { %775 = vmatmul.mubr.msk.bf16.vlgmr.msra.gmra.mrb[4].mxu0 %vm199_vm0, %v188_v14  ;;  %758 = vmatprep.mubr.msk.bf16.mxu1 %vm199_vm0, %v107_v45  ;;  %v120_v52 = vmul.f32 %v934_v27, %v113_v41  ;;  %v130_v53 = vmul.f32 %v895_v9, %v128_v48  ;;  %v131_v54 = vmul.f32 %v897_v10, %v128_v48 }
  0x19   :  { %778 = vmatprep.mubr.msk.bf16.mxu0 %vm199_vm0, %v189_v33  ;;  %v132_v6 = vmul.f32 %v915_v18, %v128_v48  ;;  %v133_v7 = vmul.f32 %v917_v19, %v128_v48  ;;  %v190_v11 = vpack.c.bf16 %v186_v44, %v185_v43  ;;  %759 = vmatmul.mubr.msk.bf16.vlgmr.msra.gmra.mrb[0].mxu1 %vm199_vm0, %v108_v49 }
  0x1a   :  { %v134_v16 = vmul.f32 %v936_v28, %v128_v48  ;;  %v135_v55 = vmul.f32 %v938_v29, %v128_v48  ;;  %763 = vmatpush3.bf16.msra.mxu1 %v943_v30  ;;  %v138_v17 = vadd.f32 %v130_v53, %v115_v22  ;;  %v139_v26 = vadd.f32 %v131_v54, %v116_v47 }
  0x1b   :  { %v140_v27 = vadd.f32 %v132_v6, %v117_v23  ;;  %v141_v56 = vadd.f32 %v133_v7, %v118_v50  ;;  %v121_v18 = vmul.f32 %v982_v60, %v113_v41  ;;  %v122_v58 = vmul.f32 %v985_v0, %v113_v41 }
  0x1c   :  { %v142_v9 = vadd.f32 %v134_v16, %v119_v51  ;;  %v143_v57 = vadd.f32 %v135_v55, %v120_v52  ;;  %v146_v10 = vpack.c.bf16 %v139_v26, %v138_v17  ;;  %v136_v59 = vmul.f32 %v729_v4, %v128_v48 }
  0x1d   :  { %v147_v19 = vpack.c.bf16 %v141_v56, %v140_v27  ;;  %v137_v28 = vmul.f32 %v730_v12, %v128_v48 }
  0x1e   :  { %764 = vmatprep.mubr.msk.bf16.mxu1 %vm199_vm0, %v146_v10  ;;  %v148_v29 = vpack.c.bf16 %v143_v57, %v142_v9  ;;  %v144_v30 = vadd.f32 %v136_v59, %v121_v18 }
  0x1f   :  { %v145_v61 = vadd.f32 %v137_v28, %v122_v58 }
  0x20   :  { %779 = vmatmul.mubr.msk.bf16.gmra.mrb[8].mxu0 %vm199_vm0, %v190_v11 }
  0x21   :  { %765 = vmatmul.mubr.msk.bf16.vlgmr.msra.gmra.mrb[4].mxu1 %vm199_vm0, %v147_v19  ;;  %v149_v62 = vpack.c.bf16 %v145_v61, %v144_v30 }
  0x22   :  { %768 = vmatprep.mubr.msk.bf16.mxu1 %vm199_vm0, %v148_v29 }
  0x29   :  { %769 = vmatmul.mubr.msk.bf16.gmra.mrb[8].mxu1 %vm199_vm0, %v149_v62 }
  0xe3   :  { %v756_v60 = vpop.f32.mrb[0].mxu0 }
  0xe4   :  { %v677_v63 = vpack.c.bf16 %v756_v60, %v756_v60  ;;  %v246_v1 = vpop.f32.mrb[1].mxu0 }
  0xe5   :  { %v675_v2 = vpack.c.bf16 %v246_v1, %v246_v1  ;;  %v757_v0 = vpop.f32.mrb[2].mxu0 }
  0xe6   :  { %312 = vst.msk [vmem:[%s1138_s8 + $0x8] sm:$0xf] %vm309_vm1, %v677_v63  ;;  %v678_v3 = vpack.c.bf16 %v757_v0, %v757_v0  ;;  %v249_v4 = vpop.f32.mrb[3].mxu0 }
  0xe7   :  { %310 = vst.msk [vmem:[%s1138_s8] sm:$0xf] %vm309_vm1, %v675_v2  ;;  %v676_v5 = vpack.c.bf16 %v249_v4, %v249_v4 }
  0xe8   :  { %313 = vst.msk [vmem:[%s1138_s8 + $0xc] sm:$0xf] %vm309_vm1, %v678_v3 }
  0xe9   :  { %311 = vst.msk [vmem:[%s1138_s8 + $0x4] sm:$0xf] %vm309_vm1, %v676_v5 }
  0xeb   :  { %v776_v12 = vpop.f32.mrb[4].mxu0 }
  0xec   :  { %v661_v13 = vmul.f32 -1.442695, %v776_v12  ;;  %v497_v14 = vpop.f32.mrb[5].mxu0  ;;  %v760_v31 = vpop.f32.mrb[0].mxu1 }
  0xed   :  { %v659_v15 = vmul.f32 -1.442695, %v497_v14  ;;  %v777_v20 = vpop.f32.mrb[6].mxu0  ;;  %v681_v32 = vpack.c.bf16 %v760_v31, %v760_v31  ;;  %v262_v24 = vpop.f32.mrb[1].mxu1 }
  0xee   :  { %787 = vpow2.f32 %v661_v13  ;;  %v662_v21 = vmul.f32 -1.442695, %v777_v20  ;;  %v500_v25 = vpop.f32.mrb[7].mxu0  ;;  %v679_v33 = vpack.c.bf16 %v262_v24, %v262_v24  ;;  %v761_v34 = vpop.f32.mrb[2].mxu1 }
  0xef   :  { %789 = vpow2.f32 %v659_v15  ;;  %v660_v8 = vmul.f32 -1.442695, %v500_v25  ;;  %316 = vst.msk [vmem:[%s1138_s8 + $0x18] sm:$0xf] %vm309_vm1, %v681_v32  ;;  %v682_v35 = vpack.c.bf16 %v761_v34, %v761_v34  ;;  %v265_v36 = vpop.f32.mrb[3].mxu1 }
  0xf0   :  { %791 = vpow2.f32 %v662_v21  ;;  %314 = vst.msk [vmem:[%s1138_s8 + $0x10] sm:$0xf] %vm309_vm1, %v679_v33  ;;  %v680_v38 = vpack.c.bf16 %v265_v36, %v265_v36 }
  0xf1   :  { %793 = vpow2.f32 %v660_v8  ;;  %317 = vst.msk [vmem:[%s1138_s8 + $0x1c] sm:$0xf] %vm309_vm1, %v682_v35 }
  0xf2   :  { %315 = vst.msk [vmem:[%s1138_s8 + $0x14] sm:$0xf] %vm309_vm1, %v680_v38 }
  0xf3   :  { %v780_v37 = vpop.f32.mrb[8].mxu0 }
  0xf4   :  { %v665_v39 = vmul.f32 -1.442695, %v780_v37  ;;  %v513_v40 = vpop.f32.mrb[9].mxu0  ;;  %v766_v46 = vpop.f32.mrb[4].mxu1 }
  0xf5   :  { %v663_v41 = vmul.f32 -1.442695, %v513_v40  ;;  %v781_v42 = vpop.f32.mrb[10].mxu0  ;;  %v685_v47 = vpack.c.bf16 %v766_v46, %v766_v46  ;;  %v372_v48 = vpop.f32.mrb[5].mxu1 }
  0xf6   :  { %795 = vpow2.f32 %v665_v39  ;;  %v666_v43 = vmul.f32 -1.442695, %v781_v42  ;;  %v516_v44 = vpop.f32.mrb[11].mxu0  ;;  %v683_v50 = vpack.c.bf16 %v372_v48, %v372_v48  ;;  %v767_v51 = vpop.f32.mrb[6].mxu1 }
  0xf7   :  { %797 = vpow2.f32 %v663_v41  ;;  %v664_v45 = vmul.f32 -1.442695, %v516_v44  ;;  %437 = vst.msk [vmem:[%s1139_s9 + $0x8] sm:$0xf] %vm309_vm1, %v685_v47  ;;  %v686_v54 = vpack.c.bf16 %v767_v51, %v767_v51  ;;  %v375_v6 = vpop.f32.mrb[7].mxu1 }
  0xf8   :  { %v788_v22 = vpop.eup %787  ;;  %799 = vpow2.f32 %v666_v43  ;;  %435 = vst.msk [vmem:[%s1139_s9] sm:$0xf] %vm309_vm1, %v683_v50  ;;  %v684_v16 = vpack.c.bf16 %v375_v6, %v375_v6 }
  0xf9   :  { %v790_v23 = vpop.eup %789  ;;  %v554_v49 = vadd.f32 1.0, %v788_v22  ;;  %801 = vpow2.f32 %v664_v45  ;;  %438 = vst.msk [vmem:[%s1139_s9 + $0xc] sm:$0xf] %vm309_vm1, %v686_v54 }
  0xfa   :  { %v792_v52 = vpop.eup %791  ;;  %v552_v53 = vadd.f32 1.0, %v790_v23  ;;  %436 = vst.msk [vmem:[%s1139_s9 + $0x4] sm:$0xf] %vm309_vm1, %v684_v16 }
  0xfb   :  { %v794_v7 = vpop.eup %793  ;;  %803 = vrcp.f32 %v554_v49  ;;  %v555_v11 = vadd.f32 1.0, %v792_v52 }
  0xfc   :  { %805 = vrcp.f32 %v552_v53  ;;  %v553_v55 = vadd.f32 1.0, %v794_v7  ;;  %v770_v17 = vpop.f32.mrb[8].mxu1 }
  0xfd   :  { %807 = vrcp.f32 %v555_v11  ;;  %v689_v27 = vpack.c.bf16 %v770_v17, %v770_v17  ;;  %v388_v56 = vpop.f32.mrb[9].mxu1 }
  0xfe   :  { %809 = vrcp.f32 %v553_v55  ;;  %v687_v10 = vpack.c.bf16 %v388_v56, %v388_v56  ;;  %v771_v18 = vpop.f32.mrb[10].mxu1 }
  0xff   :  { %441 = vst.msk [vmem:[%s1139_s9 + $0x18] sm:$0xf] %vm309_vm1, %v689_v27  ;;  %v690_v59 = vpack.c.bf16 %v771_v18, %v771_v18  ;;  %v391_v28 = vpop.f32.mrb[11].mxu1 }
 0x100   :  { %v796_v26 = vpop.eup %795  ;;  %439 = vst.msk [vmem:[%s1139_s9 + $0x10] sm:$0xf] %vm309_vm1, %v687_v10  ;;  %v688_v61 = vpack.c.bf16 %v391_v28, %v391_v28 }
 0x101   :  { %v798_v9 = vpop.eup %797  ;;  %v558_v57 = vadd.f32 1.0, %v796_v26  ;;  %442 = vst.msk [vmem:[%s1139_s9 + $0x1c] sm:$0xf] %vm309_vm1, %v690_v59 }
 0x102   :  { %v800_v19 = vpop.eup %799  ;;  %v556_v58 = vadd.f32 1.0, %v798_v9  ;;  %440 = vst.msk [vmem:[%s1139_s9 + $0x14] sm:$0xf] %vm309_vm1, %v688_v61 }
 0x103   :  { %v802_v29 = vpop.eup %801  ;;  %811 = vrcp.f32 %v558_v57  ;;  %v559_v30 = vadd.f32 1.0, %v800_v19 }
 0x104   :  { %813 = vrcp.f32 %v556_v58  ;;  %v557_v62 = vadd.f32 1.0, %v802_v29 }
 0x105   :  { %v804_v60 = vpop.eup %803  ;;  %815 = vrcp.f32 %v559_v30 }
 0x106   :  { %v806_v63 = vpop.eup %805  ;;  %v693_v1 = vpack.c.bf16 %v804_v60, %v804_v60  ;;  %817 = vrcp.f32 %v557_v62 }
 0x107   :  { %v808_v2 = vpop.eup %807  ;;  %v691_v0 = vpack.c.bf16 %v806_v63, %v806_v63 }
 0x108   :  { %v810_v3 = vpop.eup %809  ;;  %610 = vst.msk [vmem:[%s1140_s10 + $0x8] sm:$0xf] %vm309_vm1, %v693_v1  ;;  %v694_v4 = vpack.c.bf16 %v808_v2, %v808_v2 }
 0x109   :  { %608 = vst.msk [vmem:[%s1140_s10] sm:$0xf] %vm309_vm1, %v691_v0  ;;  %v692_v5 = vpack.c.bf16 %v810_v3, %v810_v3 }
 0x10a   :  { %611 = vst.msk [vmem:[%s1140_s10 + $0xc] sm:$0xf] %vm309_vm1, %v694_v4 }
 0x10b   :  { %609 = vst.msk [vmem:[%s1140_s10 + $0x4] sm:$0xf] %vm309_vm1, %v692_v5 }
 0x10d   :  { %v812_v12 = vpop.eup %811 }
 0x10e   :  { %v814_v13 = vpop.eup %813  ;;  %v697_v14 = vpack.c.bf16 %v812_v12, %v812_v12 }
 0x10f   :  { %v816_v15 = vpop.eup %815  ;;  %v695_v20 = vpack.c.bf16 %v814_v13, %v814_v13 }
 0x110   :  { %v818_v21 = vpop.eup %817  ;;  %614 = vst.msk [vmem:[%s1140_s10 + $0x18] sm:$0xf] %vm309_vm1, %v697_v14  ;;  %v698_v25 = vpack.c.bf16 %v816_v15, %v816_v15 }
 0x111   :  { %612 = vst.msk [vmem:[%s1140_s10 + $0x10] sm:$0xf] %vm309_vm1, %v695_v20  ;;  %v696_v8 = vpack.c.bf16 %v818_v21, %v818_v21 }
 0x112   :  { %615 = vst.msk [vmem:[%s1140_s10 + $0x1c] sm:$0xf] %vm309_vm1, %v698_v25 }
 0x113   :  { %613 = vst.msk [vmem:[%s1140_s10 + $0x14] sm:$0xf] %vm309_vm1, %v696_v8 }

// kernel: rwkv_forward.21
= control target key start
LH: loop header
LB: loop body
LE: loop exit
PB: predicated region body
PF: predicated region fallthrough
CT: control target
= control target key end

     0   :  { %v301_v2 = vmov -1e+38   ;;  %v305_v3 = vmov 0.0   ;;  %v309_v4 = vmov 0.0   ;;  %s368_s19 = smov 0   ;;  %s432_s0 = inlined_call_operand.vmem [shape: f32[1,16], index: 0, kind: input, shape index: {}]   ;;  %s433_s1 = inlined_call_operand.vmem [shape: f32[1,16], index: 1, kind: input, shape index: {}]   ;;  %s434_s2 = inlined_call_operand.vmem [shape: bf16[32,2,16], index: 2, kind: input, shape index: {}]   ;;  %s435_s3 = inlined_call_operand.vmem [shape: bf16[32,2,16], index: 3, kind: input, shape index: {}]   ;;  %s436_s4 = inlined_call_operand.vmem [shape: bf16[32,2,16], index: 4, kind: output, shape index: {}]  }
   0x1   :  { %v361_v0 = vld [vmem:[%s432_s0] ss:$0 sm:$0xff] }
   0x2   :  { %v366_v1 = vld [vmem:[%s433_s1] ss:$0 sm:$0xff] }
   0x3 LB: > { %vm30_vm0 = vcmask 123904   ;;  %s185_s0 = sshll.u32 %s315_s19, 1  ;;  %s36_s23 = scalar_lea.vmem %s434_s2, %s315_s19  ;;  %v48_v5 = vsub.f32 %v303_v2, %v361_v0  ;;  %s315_s19 = sphi %s368_s19, %s24_s19   ;;  %v311_v4 = vphi %v309_v4, %v58_v4   ;;  %v307_v3 = vphi %v305_v3, %v60_v3   ;;  %v303_v2 = vphi %v301_v2, %v49_v2  }
   0x4   : > { %s29_s20 = scalar_lea.vmem [#allocation2], %s185_s0  ;;  %s32_s1 = scalar_lea.vmem [#allocation3], %s185_s0  ;;  %v37_v6 = vld [vmem:[%s36_s23] sm:$0x1] }
   0x5   : > { %31 = vst.msk [vmem:[%s29_s20] sm:$0x3] %vm30_vm0, %v311_v4  ;;  %33 = vst.msk [vmem:[%s32_s1] sm:$0x3] %vm30_vm0, %v307_v3  ;;  %s34_s24 = scalar_lea.vmem [#allocation4], %s185_s0  ;;  %v38_v7 = vunpack.c.l.bf16 %v37_v6  ;;  %s39_s27 = scalar_lea.vmem %s435_s3, %s315_s19 }
   0x6   : > { %35 = vst.msk [vmem:[%s34_s24] sm:$0x3] %vm30_vm0, %v303_v2  ;;  %v40_v12 = vld [vmem:[%s39_s27] sm:$0x1]  ;;  %s24_s19 = sadd.s32 1, %s315_s19  }
   0x7   : > { %v49_v2 = vmax.f32 %v48_v5, %v38_v7   ;;  %v41_v13 = vunpack.c.l.bf16 %v40_v12  ;;  %p21_p0 = scmp.ge.s32.totalorder %s24_s19, 32  }
   0x8   :  { %v386_v19 = vmov (%p21_p0), -1e+38   ;;  %v388_v20 = vmov (%p21_p0), 0.0   ;;  %v390_v21 = vmov (%p21_p0), 0.0   ;;  %s392_s28 = smov (%p21_p0), 0  }
   0x9   : > { %v50_v8 = vsub.f32 %v48_v5, %v49_v2  ;;  %v53_v9 = vsub.f32 %v38_v7, %v49_v2 }
   0xb   : > { %v51_v10 = vmul.f32 1.442695, %v50_v8  ;;  %v54_v11 = vmul.f32 1.442695, %v53_v9 }
   0xd   : > { %253 = vpow2.f32 %v51_v10 }
   0xe   : > { %255 = vpow2.f32 %v54_v11 }
  0x15   :  { %23 = sbr.rel (!%p21_p0) target bundleno = 3 (0x3), region = 61 }
  0x17   : > { %v254_v14 = vpop.eup %253 }
  0x18   : > { %v256_v15 = vpop.eup %255  ;;  %v56_v16 = vmul.f32 %v311_v4, %v254_v14  ;;  %v59_v17 = vmul.f32 %v307_v3, %v254_v14 }
  0x19   : > { %v57_v18 = vmul.f32 %v256_v15, %v41_v13 }
  0x1a   : > { %v60_v3 = vadd.f32 %v256_v15, %v59_v17  }
  0x1b   : > { %v58_v4 = vadd.f32 %v57_v18, %v56_v16  }
  0x1c LB: > { %s401_s29 = ssub.s32 31, %s331_s28  ;;  %v123_v22 = vsub.f32 %v319_v19, %v361_v0  ;;  %vm115_vm1 = vcmask 122880   ;;  %s66_s28 = sadd.s32 1, %s331_s28   ;;  %s331_s28 = sphi %s392_s28, %s66_s28   ;;  %v327_v21 = vphi %v390_v21, %v439_v21   ;;  %v323_v20 = vphi %v388_v20, %v438_v20   ;;  %v319_v19 = vphi %v386_v19, %v437_v19  }
  0x1d   : > { %s71_s6 = scalar_lea.vmem %s434_s2, %s401_s29  ;;  %s409_s7 = sshll.u32 %s401_s29, 1 }
  0x1e   : > { %v72_v23 = vld [vmem:[%s71_s6] sm:$0x1]  ;;  %s82_s8 = scalar_lea.vmem [#allocation4], %s409_s7  ;;  %s74_s11 = scalar_lea.vmem %s435_s3, %s401_s29 }
  0x1f   : > { %v73_v24 = vunpack.c.l.bf16 %v72_v23  ;;  %v83_v25 = vld [vmem:[%s82_s8] sm:$0x3]  ;;  %s80_s12 = scalar_lea.vmem [#allocation3], %s409_s7  ;;  %s78_s13 = scalar_lea.vmem [#allocation2], %s409_s7 }
  0x20   : > { %v91_v28 = vmax.f32 %v83_v25, %v319_v19  ;;  %v75_v40 = vld [vmem:[%s74_s11] sm:$0x1]  ;;  %s114_s16 = scalar_lea.vmem %s436_s4, %s401_s29  ;;  %p63_p1 = scmp.ge.s32.totalorder %s66_s28, 32  }
  0x21   : > { %v90_v26 = vadd.f32 %v366_v1, %v73_v24  ;;  %v124_v27 = vmax.f32 %v123_v22, %v73_v24   ;;  %v76_v42 = vunpack.c.l.bf16 %v75_v40  ;;  %v81_v44 = vld [vmem:[%s80_s12] sm:$0x3] }
  0x22   : > { %v79_v55 = vld [vmem:[%s78_s13] sm:$0x3] }
  0x23   : > { %v125_v29 = vsub.f32 %v123_v22, %v124_v27  ;;  %v128_v30 = vsub.f32 %v73_v24, %v124_v27  ;;  %v92_v31 = vmax.f32 %v91_v28, %v90_v26 }
  0x25   : > { %v126_v32 = vmul.f32 1.442695, %v125_v29  ;;  %v129_v33 = vmul.f32 1.442695, %v128_v30  ;;  %v93_v34 = vsub.f32 %v83_v25, %v92_v31  ;;  %v96_v35 = vsub.f32 %v319_v19, %v92_v31 }
  0x26   : > { %v99_v36 = vsub.f32 %v90_v26, %v92_v31  ;;  %v437_v19 = vmov %v124_v27 }
  0x27   : > { %257 = vpow2.f32 %v126_v32  ;;  %v94_v37 = vmul.f32 1.442695, %v93_v34  ;;  %v97_v38 = vmul.f32 1.442695, %v96_v35 }
  0x28   : > { %259 = vpow2.f32 %v129_v33  ;;  %v100_v39 = vmul.f32 1.442695, %v99_v36 }
  0x29   : > { %261 = vpow2.f32 %v94_v37 }
  0x2a   : > { %263 = vpow2.f32 %v97_v38 }
  0x2b   : > { %265 = vpow2.f32 %v100_v39 }
  0x31   : > { %v258_v41 = vpop.eup %257 }
  0x32   : > { %v260_v43 = vpop.eup %259  ;;  %v131_v45 = vmul.f32 %v327_v21, %v258_v41  ;;  %v134_v46 = vmul.f32 %v323_v20, %v258_v41 }
  0x33   : > { %v132_v47 = vmul.f32 %v260_v43, %v76_v42  ;;  %v262_v48 = vpop.eup %261 }
  0x34   : > { %v135_v49 = vadd.f32 %v260_v43, %v134_v46   ;;  %v264_v50 = vpop.eup %263  ;;  %v107_v51 = vmul.f32 %v262_v48, %v81_v44  ;;  %v102_v58 = vmul.f32 %v262_v48, %v79_v55 }
  0x35   : > { %v133_v52 = vadd.f32 %v132_v47, %v131_v45   ;;  %v108_v53 = vmul.f32 %v323_v20, %v264_v50  ;;  %v266_v54 = vpop.eup %265  ;;  %v103_v59 = vmul.f32 %v327_v21, %v264_v50 }
  0x36   : > { %v105_v61 = vmul.f32 %v266_v54, %v76_v42  ;;  %v438_v20 = vmov %v135_v49 }
  0x37   : > { %v109_v56 = vadd.f32 %v108_v53, %v107_v51  ;;  %v104_v60 = vadd.f32 %v103_v59, %v102_v58  ;;  %v439_v21 = vmov %v133_v52 }
  0x39   : > { %v110_v57 = vadd.f32 %v266_v54, %v109_v56  ;;  %v106_v62 = vadd.f32 %v105_v61, %v104_v60 }
  0x3b   : > { %267 = vrcp.f32 %v110_v57 }
  0x44   :  { %65 = sbr.rel (!%p63_p1) target bundleno = 28 (0x1c), region = 72 }
  0x45   : > { %v268_v63 = vpop.eup %267 }
  0x46   : > { %v112_v2 = vmul.f32 %v268_v63, %v106_v62 }
  0x48   : > { %v113_v3 = vpack.c.bf16 %v112_v2, %v112_v2 }
  0x4a   : > { %116 = vst.msk [vmem:[%s114_s16] sm:$0x1] %vm115_vm1, %v113_v3 }

// kernel: rwkv_forward.24
= control target key start
LH: loop header
LB: loop body
LE: loop exit
PB: predicated region body
PF: predicated region fallthrough
CT: control target
= control target key end

     0   :  { %v101_v0 = vlaneseq  ;;  %vm165_vm0 = vcmask 130048   ;;  %s536_s6 = inlined_call_operand.vmem [shape: bf16[16,16], index: 6, kind: input, shape index: {}]   ;;  %s537_s0 = inlined_call_operand.vmem [shape: bf16[64,16], index: 0, kind: input, shape index: {}]   ;;  %s538_s1 = inlined_call_operand.vmem [shape: bf16[64,16], index: 1, kind: input, shape index: {}]   ;;  %s539_s2 = inlined_call_operand.vmem [shape: bf16[64,16], index: 2, kind: input, shape index: {}]   ;;  %s540_s3 = inlined_call_operand.vmem [shape: bf16[64,16], index: 3, kind: input, shape index: {}]   ;;  %s541_s5 = inlined_call_operand.vmem [shape: f32[1,16], index: 5, kind: input, shape index: {}]   ;;  %s542_s4 = inlined_call_operand.vmem [shape: f32[64,16], index: 4, kind: input, shape index: {}]   ;;  %s543_s7 = inlined_call_operand.vmem [shape: f32[64,16], index: 7, kind: output, shape index: {}]  }
   0x1   :  { %v361_v1 = vld [vmem:[%s536_s6] sm:$0xff]   ;;  %v333_v12 = vld [vmem:[%s537_s0 + $0x10] sm:$0xff]   ;;  %v332_v36 = vld [vmem:[%s537_s0 + $0x8] sm:$0xff]  }
   0x2   :  { %v27_v2 = vld [vmem:[%s541_s5] sm:$0x1]  ;;  %v102_v5 = vshrl.u32 %v101_v0, 7  ;;  %349 = vmatprep.subr.bf16.mxu0 %v361_v1  ;;  %359 = vmatprep.subr.bf16.mxu1 %v361_v1  ;;  %v336_v17 = vld [vmem:[%s538_s1 + $0x10] sm:$0xff]   ;;  %v278_v26 = vunpack.c.l.bf16 %v333_v12  ;;  %v279_v27 = vunpack.c.h.bf16 %v333_v12  ;;  %v335_v45 = vld [vmem:[%s538_s1 + $0x8] sm:$0xff]   ;;  %v274_v49 = vunpack.c.l.bf16 %v332_v36 }
   0x3   :  { %v269_v3 = vld [vmem:[%s537_s0] sm:$0xff]   ;;  %350 = vmatpush3.bf16.msra.mxu0 %v361_v1  ;;  %360 = vmatpush3.bf16.msra.mxu1 %v361_v1  ;;  %v114_v21 = vsub.f32 1.0, %v27_v2  ;;  %v339_v22 = vld [vmem:[%s539_s2 + $0x10] sm:$0xff]   ;;  %v294_v30 = vunpack.c.l.bf16 %v336_v17  ;;  %v295_v31 = vunpack.c.h.bf16 %v336_v17  ;;  %v338_v46 = vld [vmem:[%s539_s2 + $0x8] sm:$0xff]   ;;  %v275_v50 = vunpack.c.h.bf16 %v332_v36 }
   0x4   :  { %v285_v4 = vld [vmem:[%s538_s1] sm:$0xff]   ;;  %v270_v6 = vunpack.c.l.bf16 %v269_v3  ;;  %v271_v7 = vunpack.c.h.bf16 %v269_v3  ;;  %v103_v20 = vsub.s32 0, %v102_v5  ;;  %v342_v23 = vld [vmem:[%s540_s3 + $0x10] sm:$0xff]   ;;  %v310_v32 = vunpack.c.l.bf16 %v339_v22  ;;  %v341_v51 = vld [vmem:[%s540_s3 + $0x8] sm:$0xff]  }
   0x5   :  { %v286_v8 = vunpack.c.l.bf16 %v285_v4  ;;  %v287_v9 = vunpack.c.h.bf16 %v285_v4  ;;  %v301_v10 = vld [vmem:[%s539_s2] sm:$0xff]   ;;  %v311_v33 = vunpack.c.h.bf16 %v339_v22  ;;  %v326_v34 = vunpack.c.l.bf16 %v342_v23  ;;  %v334_v56 = vld [vmem:[%s537_s0 + $0x18] sm:$0xff]  }
   0x6   :  { %v317_v11 = vld [vmem:[%s540_s3] sm:$0xff]   ;;  %v302_v13 = vunpack.c.l.bf16 %v301_v10  ;;  %v303_v14 = vunpack.c.h.bf16 %v301_v10  ;;  %v432_v28 = vrot.slane %v27_v2, %v103_v20  ;;  %v434_v29 = vrot.slane %v114_v21, %v103_v20  ;;  %v337_v61 = vld [vmem:[%s538_s1 + $0x18] sm:$0xff]  }
   0x7   :  { %v318_v15 = vunpack.c.l.bf16 %v317_v11  ;;  %v319_v16 = vunpack.c.h.bf16 %v317_v11  ;;  %v92_v18 = vmul.f32 %v286_v8, %v270_v6  ;;  %v93_v19 = vmul.f32 %v287_v9, %v271_v7  ;;  %v340_v6 = vld [vmem:[%s539_s2 + $0x18] sm:$0xff]  }
   0x8   :  { %v327_v35 = vunpack.c.h.bf16 %v342_v23  ;;  %v96_v41 = vmul.f32 %v294_v30, %v278_v26  ;;  %v97_v42 = vmul.f32 %v295_v31, %v279_v27  ;;  %v119_v43 = vmul.f32 %v326_v34, %v310_v32  ;;  %v343_v7 = vld [vmem:[%s540_s3 + $0x18] sm:$0xff]  }
   0x9   :  { %v115_v24 = vmul.f32 %v318_v15, %v302_v13  ;;  %v116_v25 = vmul.f32 %v319_v16, %v303_v14  ;;  %v106_v37 = vmul.f32 %v432_v28, %v92_v18  ;;  %v107_v38 = vmul.f32 %v432_v28, %v93_v19 }
   0xa   :  { %v120_v44 = vmul.f32 %v327_v35, %v311_v33  ;;  %v110_v52 = vmul.f32 %v432_v28, %v96_v41  ;;  %v111_v53 = vmul.f32 %v432_v28, %v97_v42  ;;  %v133_v54 = vmul.f32 %v434_v29, %v119_v43  ;;  %v146_v42 = vld [vmem:[%s542_s4 + $0x8] sm:$0xff]  ;;  %v151_v43 = vld [vmem:[%s542_s4 + $0x30] sm:$0xff] }
   0xb   :  { %v129_v39 = vmul.f32 %v434_v29, %v115_v24  ;;  %v130_v40 = vmul.f32 %v434_v29, %v116_v25  ;;  %v290_v58 = vunpack.c.l.bf16 %v335_v45  ;;  %v291_v59 = vunpack.c.h.bf16 %v335_v45 }
   0xc   :  { %v134_v55 = vmul.f32 %v434_v29, %v120_v44  ;;  %v306_v60 = vunpack.c.l.bf16 %v338_v46  ;;  %v141_v62 = vadd.f32 %v133_v54, %v110_v52  ;;  %v307_v0 = vunpack.c.h.bf16 %v338_v46  ;;  %v149_v46 = vld [vmem:[%s542_s4 + $0x20] sm:$0xff]  ;;  %v150_v54 = vld [vmem:[%s542_s4 + $0x28] sm:$0xff] }
   0xd   :  { %v137_v47 = vadd.f32 %v129_v39, %v106_v37  ;;  %v138_v48 = vadd.f32 %v130_v40, %v107_v38  ;;  %v322_v1 = vunpack.c.l.bf16 %v341_v51  ;;  %v323_v2 = vunpack.c.h.bf16 %v341_v51  ;;  %v147_v38 = vld [vmem:[%s542_s4 + $0x10] sm:$0xff] }
   0xe   :  { %v142_v63 = vadd.f32 %v134_v55, %v111_v53  ;;  %v94_v3 = vmul.f32 %v290_v58, %v274_v49  ;;  %v95_v4 = vmul.f32 %v291_v59, %v275_v50  ;;  %v282_v5 = vunpack.c.l.bf16 %v334_v56  ;;  %v152_v50 = vld [vmem:[%s542_s4 + $0x38] sm:$0xff] }
   0xf   :  { %v153_v57 = vpack.c.bf16 %v138_v48, %v137_v47  ;;  %v117_v9 = vmul.f32 %v322_v1, %v306_v60  ;;  %v283_v10 = vunpack.c.h.bf16 %v334_v56  ;;  %v298_v11 = vunpack.c.l.bf16 %v337_v61 }
  0x10   :  { %v155_v8 = vpack.c.bf16 %v142_v63, %v141_v62  ;;  %v108_v12 = vmul.f32 %v432_v28, %v94_v3  ;;  %v109_v13 = vmul.f32 %v432_v28, %v95_v4  ;;  %v118_v14 = vmul.f32 %v323_v2, %v307_v0 }
  0x11   :  { %351 = vmatprep.mubr.msk.bf16.mxu0 %vm165_vm0, %v153_v57  ;;  %v299_v15 = vunpack.c.h.bf16 %v337_v61  ;;  %v131_v16 = vmul.f32 %v434_v29, %v117_v9  ;;  %v314_v17 = vunpack.c.l.bf16 %v340_v6  ;;  %v315_v18 = vunpack.c.h.bf16 %v340_v6 }
  0x12   :  { %355 = vmatprep.mubr.msk.bf16.mxu1 %vm165_vm0, %v155_v8  ;;  %v330_v19 = vunpack.c.l.bf16 %v343_v7  ;;  %v132_v20 = vmul.f32 %v434_v29, %v118_v14  ;;  %v331_v21 = vunpack.c.h.bf16 %v343_v7  ;;  %v98_v22 = vmul.f32 %v298_v11, %v282_v5 }
  0x13   :  { %v99_v23 = vmul.f32 %v299_v15, %v283_v10  ;;  %v139_v24 = vadd.f32 %v131_v16, %v108_v12 }
  0x14   :  { %v121_v25 = vmul.f32 %v330_v19, %v314_v17  ;;  %v140_v26 = vadd.f32 %v132_v20, %v109_v13  ;;  %v112_v27 = vmul.f32 %v432_v28, %v98_v22  ;;  %v122_v31 = vmul.f32 %v331_v21, %v315_v18 }
  0x15   :  { %v113_v30 = vmul.f32 %v432_v28, %v99_v23  ;;  %v145_v28 = vld [vmem:[%s542_s4] sm:$0xff] }
  0x16   :  { %v135_v32 = vmul.f32 %v434_v29, %v121_v25  ;;  %v154_v33 = vpack.c.bf16 %v140_v26, %v139_v24  ;;  %v136_v34 = vmul.f32 %v434_v29, %v122_v31  ;;  %v148_v29 = vld [vmem:[%s542_s4 + $0x18] sm:$0xff] }
  0x18   :  { %v143_v35 = vadd.f32 %v135_v32, %v112_v27  ;;  %352 = vmatmul.mubr.msk.bf16.vlgmr.msra.gmra.mrb[0].mxu0 %vm165_vm0, %v154_v33  ;;  %v144_v36 = vadd.f32 %v136_v34, %v113_v30 }
  0x1a   :  { %v156_v37 = vpack.c.bf16 %v144_v36, %v143_v35 }
  0x1c   :  { %356 = vmatmul.mubr.msk.bf16.vlgmr.msra.gmra.mrb[0].mxu1 %vm165_vm0, %v156_v37 }
  0xeb   :  { %v353_v39 = vpop.f32.mrb[0].mxu0 }
  0xec   :  { %v245_v40 = vadd.f32 %v353_v39, %v147_v38  ;;  %v212_v41 = vpop.f32.mrb[1].mxu0 }
  0xed   :  { %v243_v44 = vadd.f32 %v212_v41, %v145_v28  ;;  %v354_v45 = vpop.f32.mrb[2].mxu0 }
  0xee   :  { %253 = vst.msk [vmem:[%s543_s7 + $0x10] sm:$0xff] %vm165_vm0, %v245_v40  ;;  %v246_v47 = vadd.f32 %v354_v45, %v148_v29  ;;  %v215_v48 = vpop.f32.mrb[3].mxu0 }
  0xef   :  { %v357_v49 = vpop.f32.mrb[0].mxu1  ;;  %251 = vst.msk [vmem:[%s543_s7] sm:$0xff] %vm165_vm0, %v243_v44  ;;  %v244_v51 = vadd.f32 %v215_v48, %v146_v42 }
  0xf0   :  { %v249_v52 = vadd.f32 %v357_v49, %v151_v43  ;;  %v228_v53 = vpop.f32.mrb[1].mxu1  ;;  %254 = vst.msk [vmem:[%s543_s7 + $0x18] sm:$0xff] %vm165_vm0, %v246_v47 }
  0xf1   :  { %v247_v55 = vadd.f32 %v228_v53, %v149_v46  ;;  %v358_v56 = vpop.f32.mrb[2].mxu1  ;;  %252 = vst.msk [vmem:[%s543_s7 + $0x8] sm:$0xff] %vm165_vm0, %v244_v51 }
  0xf2   :  { %257 = vst.msk [vmem:[%s543_s7 + $0x30] sm:$0xff] %vm165_vm0, %v249_v52  ;;  %v250_v57 = vadd.f32 %v358_v56, %v152_v50  ;;  %v231_v58 = vpop.f32.mrb[3].mxu1 }
  0xf3   :  { %255 = vst.msk [vmem:[%s543_s7 + $0x20] sm:$0xff] %vm165_vm0, %v247_v55  ;;  %v248_v59 = vadd.f32 %v231_v58, %v150_v54 }
  0xf4   :  { %258 = vst.msk [vmem:[%s543_s7 + $0x38] sm:$0xff] %vm165_vm0, %v250_v57 }
  0xf5   :  { %256 = vst.msk [vmem:[%s543_s7 + $0x28] sm:$0xff] %vm165_vm0, %v248_v59 }

// kernel: rwkv_forward.26
= control target key start
LH: loop header
LB: loop body
LE: loop exit
PB: predicated region body
PF: predicated region fallthrough
CT: control target
= control target key end

     0   :  { %v68_v0 = vlaneseq  ;;  %vm108_vm0 = vcmask 130048   ;;  %vm271_vm1 = vcmask 523264   ;;  %s1092_s5 = inlined_call_operand.vmem [shape: bf16[16,64], index: 5, kind: input, shape index: {}]   ;;  %s1093_s0 = inlined_call_operand.vmem [shape: bf16[64,16], index: 0, kind: input, shape index: {}]   ;;  %s1094_s1 = inlined_call_operand.vmem [shape: bf16[64,16], index: 1, kind: input, shape index: {}]   ;;  %s1095_s3 = inlined_call_operand.vmem [shape: f32[1,16], index: 3, kind: input, shape index: {}]   ;;  %s1096_s7 = inlined_call_operand.vmem [shape: bf16[16,16], index: 7, kind: input, shape index: {}]   ;;  %s1097_s6 = inlined_call_operand.vmem [shape: bf16[64,16], index: 6, kind: input, shape index: {}]   ;;  %s1098_s4 = inlined_call_operand.vmem [shape: f32[1,16], index: 4, kind: input, shape index: {}]   ;;  %s1099_s2 = inlined_call_operand.vmem [shape: f32[64,16], index: 2, kind: input, shape index: {}]   ;;  %s1100_s8 = inlined_call_operand.vmem [shape: f32[64,16], index: 8, kind: output, shape index: {}]  }
   0x1   :  { %v776_v1 = vld [vmem:[%s1092_s5] sm:$0xff]   ;;  %v883_v10 = vld [vmem:[%s1093_s0 + $0x8] sm:$0xff]   ;;  %v893_v12 = vld [vmem:[%s1093_s0 + $0x10] sm:$0xff]  }
   0x2   :  { %v866_v2 = vld [vmem:[%s1093_s0] sm:$0xff]   ;;  %v69_v5 = vshrl.u32 %v68_v0, 7  ;;  %739 = vmatprep.subr.bf16.mxu0 %v776_v1  ;;  %v888_v11 = vld [vmem:[%s1094_s1 + $0x8] sm:$0xff]   ;;  %v651_v15 = vunpack.c.l.bf16 %v883_v10  ;;  %v652_v16 = vunpack.c.h.bf16 %v883_v10  ;;  %v900_v17 = vld [vmem:[%s1094_s1 + $0x10] sm:$0xff]   ;;  %v655_v22 = vunpack.c.l.bf16 %v893_v12 }
   0x3   :  { %v871_v3 = vld [vmem:[%s1094_s1] sm:$0xff]   ;;  %v647_v6 = vunpack.c.l.bf16 %v866_v2  ;;  %v648_v7 = vunpack.c.h.bf16 %v866_v2  ;;  %740 = vmatpush3.bf16.msra.mxu0 %v776_v1  ;;  %v905_v18 = vld [vmem:[%s1093_s0 + $0x18] sm:$0xff]   ;;  %v667_v20 = vunpack.c.l.bf16 %v888_v11  ;;  %v668_v21 = vunpack.c.h.bf16 %v888_v11  ;;  %v779_v38 = vld [vmem:[%s1097_s6 + $0x8] sm:$0xff]  }
   0x4   :  { %v66_v4 = vld [vmem:[%s1095_s3] sm:$0x1]  ;;  %v663_v8 = vunpack.c.l.bf16 %v871_v3  ;;  %v664_v9 = vunpack.c.h.bf16 %v871_v3  ;;  %v70_v13 = vsub.s32 0, %v69_v5  ;;  %v910_v19 = vld [vmem:[%s1094_s1 + $0x18] sm:$0xff]   ;;  %v656_v23 = vunpack.c.h.bf16 %v893_v12 }
   0x5   :  { %v81_v14 = vsub.f32 1.0, %v66_v4  ;;  %v777_v24 = vld [vmem:[%s1096_s7] sm:$0xff]   ;;  %v671_v27 = vunpack.c.l.bf16 %v900_v17  ;;  %v672_v28 = vunpack.c.h.bf16 %v900_v17  ;;  %v659_v29 = vunpack.c.l.bf16 %v905_v18 }
   0x6   :  { %v71_v25 = vrot.slane %v66_v4, %v70_v13  ;;  %v660_v30 = vunpack.c.h.bf16 %v905_v18  ;;  %v675_v31 = vunpack.c.l.bf16 %v910_v19  ;;  %v676_v32 = vunpack.c.h.bf16 %v910_v19  ;;  %765 = vmatprep.subr.bf16.mxu0 %v777_v24  ;;  %v778_v33 = vld [vmem:[%s1097_s6] sm:$0xff]   ;;  %v781_v18 = vld [vmem:[%s1097_s6 + $0x18] sm:$0xff]  }
   0x7   :  { %v86_v26 = vrot.slane %v81_v14, %v70_v13  ;;  %749 = vmatprep.subr.bf16.mxu1 %v778_v33  ;;  %v400_v51 = vld [vmem:[%s1098_s4] sm:$0x1] }
   0x8   :  { %v73_v34 = vmul.f32 %v647_v6, %v71_v25  ;;  %v74_v35 = vmul.f32 %v648_v7, %v71_v25  ;;  %v75_v39 = vmul.f32 %v651_v15, %v71_v25  ;;  %v76_v40 = vmul.f32 %v652_v16, %v71_v25  ;;  %750 = vmatpush3.bf16.msra.mxu1 %v778_v33 }
   0x9   :  { %v88_v36 = vmul.f32 %v663_v8, %v86_v26  ;;  %v89_v37 = vmul.f32 %v664_v9, %v86_v26  ;;  %v90_v41 = vmul.f32 %v667_v20, %v86_v26  ;;  %v91_v42 = vmul.f32 %v668_v21, %v86_v26  ;;  %751 = vmatprep.subr.bf16.mxu1 %v779_v38 }
   0xa   :  { %v77_v45 = vmul.f32 %v655_v22, %v71_v25  ;;  %v78_v46 = vmul.f32 %v656_v23, %v71_v25  ;;  %v92_v49 = vmul.f32 %v671_v27, %v86_v26  ;;  %v93_v50 = vmul.f32 %v672_v28, %v86_v26 }
   0xb   :  { %v96_v43 = vadd.f32 %v88_v36, %v73_v34  ;;  %v97_v44 = vadd.f32 %v89_v37, %v74_v35  ;;  %v98_v47 = vadd.f32 %v90_v41, %v75_v39  ;;  %v99_v48 = vadd.f32 %v91_v42, %v76_v40  ;;  %v780_v41 = vld [vmem:[%s1097_s6 + $0x10] sm:$0xff]  }
   0xc   :  { %v79_v53 = vmul.f32 %v659_v29, %v71_v25  ;;  %v80_v54 = vmul.f32 %v660_v30, %v71_v25  ;;  %v94_v55 = vmul.f32 %v675_v31, %v86_v26  ;;  %v100_v57 = vadd.f32 %v92_v49, %v77_v45  ;;  %752 = vmatpush3.bf16.msra.mxu1 %v779_v38 }
   0xd   :  { %v104_v52 = vpack.c.bf16 %v97_v44, %v96_v43  ;;  %v105_v56 = vpack.c.bf16 %v99_v48, %v98_v47  ;;  %v101_v58 = vadd.f32 %v93_v50, %v78_v46  ;;  %v95_v59 = vmul.f32 %v676_v32, %v86_v26  ;;  %753 = vmatprep.subr.bf16.mxu1 %v780_v41 }
   0xe   :  { %v102_v60 = vadd.f32 %v94_v55, %v79_v53  ;;  %v415_v61 = vsub.f32 1.0, %v400_v51  ;;  %v405_v0 = vrot.slane %v400_v51, %v70_v13 }
   0xf   :  { %109 = vst.msk [vmem:[#allocation3] sm:$0xff] %vm108_vm0, %v104_v52  ;;  %110 = vst.msk [vmem:[#allocation3 + $0x8] sm:$0xff] %vm108_vm0, %v105_v56  ;;  %v106_v62 = vpack.c.bf16 %v101_v58, %v100_v57  ;;  %v103_v63 = vadd.f32 %v95_v59, %v80_v54 }
  0x10   :  { %v420_v1 = vrot.slane %v415_v61, %v70_v13  ;;  %v407_v5 = vmul.f32 %v647_v6, %v405_v0  ;;  %v408_v14 = vmul.f32 %v648_v7, %v405_v0  ;;  %v409_v2 = vmul.f32 %v651_v15, %v405_v0  ;;  %754 = vmatpush3.bf16.msra.mxu1 %v780_v41 }
  0x11   :  { %111 = vst.msk [vmem:[#allocation3 + $0x10] sm:$0xff] %vm108_vm0, %v106_v62  ;;  %v107_v4 = vpack.c.bf16 %v103_v63, %v102_v60  ;;  %v410_v6 = vmul.f32 %v652_v16, %v405_v0  ;;  %v412_v37 = vmul.f32 %v656_v23, %v405_v0  ;;  %v413_v12 = vmul.f32 %v659_v29, %v405_v0 }
  0x12   :  { %v422_v25 = vmul.f32 %v663_v8, %v420_v1  ;;  %v423_v26 = vmul.f32 %v664_v9, %v420_v1  ;;  %v424_v3 = vmul.f32 %v667_v20, %v420_v1  ;;  %v425_v7 = vmul.f32 %v668_v21, %v420_v1  ;;  %755 = vmatprep.subr.bf16.mxu1 %v781_v18 }
  0x13   :  { %112 = vst.msk [vmem:[#allocation3 + $0x18] sm:$0xff] %vm108_vm0, %v107_v4  ;;  %v411_v8 = vmul.f32 %v655_v22, %v405_v0  ;;  %v426_v15 = vmul.f32 %v671_v27, %v420_v1  ;;  %v427_v10 = vmul.f32 %v672_v28, %v420_v1  ;;  %v414_v17 = vmul.f32 %v660_v30, %v405_v0 }
  0x14   :  { %v430_v35 = vadd.f32 %v422_v25, %v407_v5  ;;  %v431_v36 = vadd.f32 %v423_v26, %v408_v14  ;;  %v432_v16 = vadd.f32 %v424_v3, %v409_v2  ;;  %v433_v20 = vadd.f32 %v425_v7, %v410_v6  ;;  %756 = vmatpush3.bf16.msra.mxu1 %v781_v18 }
  0x15   :  { %v434_v11 = vadd.f32 %v426_v15, %v411_v8  ;;  %v435_v21 = vadd.f32 %v427_v10, %v412_v37  ;;  %v428_v23 = vmul.f32 %v675_v31, %v420_v1  ;;  %v429_v27 = vmul.f32 %v676_v32, %v420_v1 }
  0x16   :  { %v121_v33 = vld [vmem:[#allocation3] sm:$0xff]  ;;  %v122_v13 = vld [vmem:[#allocation3 + $0x8] sm:$0xff]  ;;  %v439_v22 = vpack.c.bf16 %v433_v20, %v432_v16  ;;  %v814_v29 = vmov 0.0  }
  0x17   :  { %741 = vmatprep.mubr.msk.bf16.mxu0 %vm108_vm0, %v121_v33  ;;  %v440_v38 = vpack.c.bf16 %v435_v21, %v434_v11  ;;  %v436_v28 = vadd.f32 %v428_v23, %v413_v12  ;;  %v437_v39 = vadd.f32 %v429_v27, %v414_v17  ;;  %115 = vst.msk [vmem:[#allocation2 + $0x10] sm:$0xff] %vm108_vm0, %v814_v29  ;;  %113 = vst.msk [vmem:[#allocation2] sm:$0xff] %vm108_vm0, %v814_v29 }
  0x18   :  { %742 = vmatmul.mubr.msk.bf16.vlgmr.msra.gmra.mrb[0].mxu0 %vm108_vm0, %v122_v13  ;;  %v123_v34 = vld [vmem:[#allocation3 + $0x10] sm:$0xff]  ;;  %114 = vst.msk [vmem:[#allocation2 + $0x8] sm:$0xff] %vm108_vm0, %v814_v29  ;;  %116 = vst.msk [vmem:[#allocation2 + $0x18] sm:$0xff] %vm108_vm0, %v814_v29 }
  0x19   :  { %766 = vmatpush3.bf16.msra.mxu0 %v777_v24  ;;  %745 = vmatprep.mubr.msk.bf16.mxu0 %vm108_vm0, %v123_v34  ;;  %v438_v24 = vpack.c.bf16 %v431_v36, %v430_v35  ;;  %v441_v40 = vpack.c.bf16 %v437_v39, %v436_v28  ;;  %117 = vst.msk [vmem:[#allocation2 + $0x20] sm:$0xff] %vm108_vm0, %v814_v29  ;;  %118 = vst.msk [vmem:[#allocation2 + $0x28] sm:$0xff] %vm108_vm0, %v814_v29 }
  0x1a   :  { %v124_v9 = vld [vmem:[#allocation3 + $0x18] sm:$0xff]  ;;  %119 = vst.msk [vmem:[#allocation2 + $0x30] sm:$0xff] %vm108_vm0, %v814_v29  ;;  %120 = vst.msk [vmem:[#allocation2 + $0x38] sm:$0xff] %vm108_vm0, %v814_v29 }
  0x1e   :  { %v233_v21 = vld [vmem:[#allocation2 + $0x10] sm:$0xff]  ;;  %v231_v12 = vld [vmem:[#allocation2] sm:$0xff] }
  0x1f   :  { %v234_v27 = vld [vmem:[#allocation2 + $0x18] sm:$0xff] }
  0x20   :  { %746 = vmatmul.mubr.msk.bf16.gmra.mrb[4].mxu0 %vm108_vm0, %v124_v9 }
  0x21   :  { %767 = vmatprep.mubr.msk.bf16.mxu0 %vm108_vm0, %v438_v24 }
  0x28   :  { %768 = vmatmul.mubr.msk.bf16.vlgmr.msra.gmra.mrb[8].mxu0 %vm108_vm0, %v439_v22 }
  0x29   :  { %771 = vmatprep.mubr.msk.bf16.mxu0 %vm108_vm0, %v440_v38 }
  0x30   :  { %772 = vmatmul.mubr.msk.bf16.gmra.mrb[12].mxu0 %vm108_vm0, %v441_v40  ;;  %v232_v40 = vld [vmem:[#allocation2 + $0x8] sm:$0xff] }
  0xeb   :  { %v743_v19 = vpop.f32.mrb[0].mxu0 }
  0xec   :  { %v213_v30 = vmax.f32 %v743_v19, 0.0  ;;  %v180_v31 = vpop.f32.mrb[1].mxu0 }
  0xed   :  { %v211_v32 = vmax.f32 %v180_v31, 0.0  ;;  %v744_v42 = vpop.f32.mrb[2].mxu0 }
  0xee   :  { %v214_v43 = vmax.f32 %v744_v42, 0.0  ;;  %v183_v44 = vpop.f32.mrb[3].mxu0  ;;  %v221_v46 = vmul.f32 %v213_v30, %v213_v30 }
  0xef   :  { %v212_v45 = vmax.f32 %v183_v44, 0.0  ;;  %v219_v48 = vmul.f32 %v211_v32, %v211_v32 }
  0xf0   :  { %v222_v47 = vmul.f32 %v214_v43, %v214_v43 }
  0xf1   :  { %v220_v49 = vmul.f32 %v212_v45, %v212_v45  ;;  %v237_v45 = vld [vmem:[#allocation2 + $0x30] sm:$0xff] }
  0xf2   :  { %v228_v50 = vpack.c.bf16 %v222_v47, %v221_v46  ;;  %v235_v47 = vld [vmem:[#allocation2 + $0x20] sm:$0xff] }
  0xf3   :  { %v747_v51 = vpop.f32.mrb[4].mxu0  ;;  %v227_v52 = vpack.c.bf16 %v220_v49, %v219_v48 }
  0xf4   :  { %v217_v53 = vmax.f32 %v747_v51, 0.0  ;;  %v196_v54 = vpop.f32.mrb[5].mxu0 }
  0xf5   :  { %v215_v55 = vmax.f32 %v196_v54, 0.0  ;;  %v748_v56 = vpop.f32.mrb[6].mxu0  ;;  %757 = vmatprep.mubr.msk.bf16.mxu1 %vm271_vm1, %v227_v52  ;;  %v236_v54 = vld [vmem:[#allocation2 + $0x28] sm:$0xff] }
  0xf6   :  { %v218_v57 = vmax.f32 %v748_v56, 0.0  ;;  %v199_v58 = vpop.f32.mrb[7].mxu0  ;;  %758 = vmatmul.mubr.msk.bf16.vlgmr.msra.gmra.mrb[0].mxu1 %vm271_vm1, %v228_v50  ;;  %v225_v60 = vmul.f32 %v217_v53, %v217_v53  ;;  %v238_v50 = vld [vmem:[#allocation2 + $0x38] sm:$0xff] }
  0xf7   :  { %v216_v59 = vmax.f32 %v199_v58, 0.0  ;;  %v223_v62 = vmul.f32 %v215_v55, %v215_v55  ;;  %v529_v55 = vld [vmem:[%s1099_s2 + $0x10] sm:$0xff] }
  0xf8   :  { %v226_v61 = vmul.f32 %v218_v57, %v218_v57 }
  0xf9   :  { %v224_v63 = vmul.f32 %v216_v59, %v216_v59 }
  0xfa   :  { %v230_v0 = vpack.c.bf16 %v226_v61, %v225_v60  ;;  %v527_v60 = vld [vmem:[%s1099_s2] sm:$0xff] }
  0xfb   :  { %v229_v1 = vpack.c.bf16 %v224_v63, %v223_v62  ;;  %v769_v4 = vpop.f32.mrb[8].mxu0 }
  0xfc   :  { %v496_v5 = vpop.f32.mrb[9].mxu0  ;;  %v639_v35 = vmul.f32 -1.442695, %v769_v4  ;;  %v530_v4 = vld [vmem:[%s1099_s2 + $0x18] sm:$0xff] }
  0xfd   :  { %761 = vmatprep.mubr.msk.bf16.mxu1 %vm271_vm1, %v229_v1  ;;  %v770_v14 = vpop.f32.mrb[10].mxu0  ;;  %v637_v36 = vmul.f32 -1.442695, %v496_v5 }
  0xfe   :  { %762 = vmatmul.mubr.msk.bf16.gmra.mrb[4].mxu1 %vm271_vm1, %v230_v0  ;;  %v499_v25 = vpop.f32.mrb[11].mxu0  ;;  %782 = vpow2.f32 %v639_v35  ;;  %v640_v2 = vmul.f32 -1.442695, %v770_v14 }
  0xff   :  { %784 = vpow2.f32 %v637_v36  ;;  %v638_v6 = vmul.f32 -1.442695, %v499_v25 }
 0x100   :  { %786 = vpow2.f32 %v640_v2 }
 0x101   :  { %788 = vpow2.f32 %v638_v6 }
 0x103   :  { %v773_v26 = vpop.f32.mrb[12].mxu0 }
 0x104   :  { %v512_v33 = vpop.f32.mrb[13].mxu0  ;;  %v643_v3 = vmul.f32 -1.442695, %v773_v26 }
 0x105   :  { %v774_v13 = vpop.f32.mrb[14].mxu0  ;;  %v641_v7 = vmul.f32 -1.442695, %v512_v33 }
 0x106   :  { %v515_v34 = vpop.f32.mrb[15].mxu0  ;;  %790 = vpow2.f32 %v643_v3  ;;  %v644_v8 = vmul.f32 -1.442695, %v774_v13  ;;  %v528_v13 = vld [vmem:[%s1099_s2 + $0x8] sm:$0xff] }
 0x107   :  { %792 = vpow2.f32 %v641_v7  ;;  %v642_v9 = vmul.f32 -1.442695, %v515_v34 }
 0x108   :  { %v783_v24 = vpop.eup %782  ;;  %794 = vpow2.f32 %v644_v8  ;;  %v533_v8 = vld [vmem:[%s1099_s2 + $0x30] sm:$0xff] }
 0x109   :  { %v785_v37 = vpop.eup %784  ;;  %v561_v15 = vadd.f32 1.0, %v783_v24  ;;  %796 = vpow2.f32 %v642_v9 }
 0x10a   :  { %v787_v10 = vpop.eup %786  ;;  %v559_v16 = vadd.f32 1.0, %v785_v37  ;;  %v531_v37 = vld [vmem:[%s1099_s2 + $0x20] sm:$0xff] }
 0x10b   :  { %v789_v20 = vpop.eup %788  ;;  %798 = vrcp.f32 %v561_v15  ;;  %v562_v11 = vadd.f32 1.0, %v787_v10 }
 0x10c   :  { %800 = vrcp.f32 %v559_v16  ;;  %v560_v38 = vadd.f32 1.0, %v789_v20  ;;  %v534_v20 = vld [vmem:[%s1099_s2 + $0x38] sm:$0xff] }
 0x10d   :  { %802 = vrcp.f32 %v562_v11 }
 0x10e   :  { %804 = vrcp.f32 %v560_v38 }
 0x110   :  { %v791_v22 = vpop.eup %790 }
 0x111   :  { %v793_v17 = vpop.eup %792  ;;  %v565_v41 = vadd.f32 1.0, %v791_v22 }
 0x112   :  { %v795_v19 = vpop.eup %794  ;;  %v563_v30 = vadd.f32 1.0, %v793_v17 }
 0x113   :  { %v797_v42 = vpop.eup %796  ;;  %806 = vrcp.f32 %v565_v41  ;;  %v566_v44 = vadd.f32 1.0, %v795_v19 }
 0x114   :  { %808 = vrcp.f32 %v563_v30  ;;  %v564_v46 = vadd.f32 1.0, %v797_v42 }
 0x115   :  { %v799_v48 = vpop.eup %798  ;;  %810 = vrcp.f32 %v566_v44 }
 0x116   :  { %v801_v51 = vpop.eup %800  ;;  %812 = vrcp.f32 %v564_v46 }
 0x117   :  { %v803_v0 = vpop.eup %802 }
 0x118   :  { %v805_v25 = vpop.eup %804 }
 0x11d   :  { %v807_v6 = vpop.eup %806 }
 0x11e   :  { %v809_v7 = vpop.eup %808 }
 0x11f   :  { %v811_v10 = vpop.eup %810 }
 0x1c9   :  { %v759_v23 = vpop.f32.mrb[0].mxu1 }
 0x1ca   :  { %v351_v28 = vadd.f32 %v759_v23, %v233_v21  ;;  %v318_v39 = vpop.f32.mrb[1].mxu1  ;;  %v813_v21 = vpop.eup %812 }
 0x1cb   :  { %v349_v18 = vadd.f32 %v318_v39, %v231_v12  ;;  %v760_v29 = vpop.f32.mrb[2].mxu1  ;;  %v532_v12 = vld [vmem:[%s1099_s2 + $0x28] sm:$0xff] }
 0x1cc   :  { %359 = vst.msk [vmem:[#allocation2 + $0x10] sm:$0xff] %vm108_vm0, %v351_v28  ;;  %v352_v31 = vadd.f32 %v760_v29, %v234_v27  ;;  %v321_v32 = vpop.f32.mrb[3].mxu1 }
 0x1cd   :  { %357 = vst.msk [vmem:[#allocation2] sm:$0xff] %vm108_vm0, %v349_v18  ;;  %v350_v43 = vadd.f32 %v321_v32, %v232_v40 }
 0x1ce   :  { %360 = vst.msk [vmem:[#allocation2 + $0x18] sm:$0xff] %vm108_vm0, %v352_v31 }
 0x1cf   :  { %358 = vst.msk [vmem:[#allocation2 + $0x8] sm:$0xff] %vm108_vm0, %v350_v43 }
 0x1d1   :  { %v763_v49 = vpop.f32.mrb[4].mxu1 }
 0x1d2   :  { %v355_v52 = vadd.f32 %v763_v49, %v237_v45  ;;  %v334_v53 = vpop.f32.mrb[5].mxu1 }
 0x1d3   :  { %v585_v56 = vld [vmem:[#allocation2 + $0x10] sm:$0xff]  ;;  %v353_v57 = vadd.f32 %v334_v53, %v235_v47  ;;  %v764_v58 = vpop.f32.mrb[6].mxu1 }
 0x1d4   :  { %v593_v59 = vmul.f32 %v799_v48, %v585_v56  ;;  %v583_v61 = vld [vmem:[#allocation2] sm:$0xff]  ;;  %363 = vst.msk [vmem:[#allocation2 + $0x30] sm:$0xff] %vm108_vm0, %v355_v52  ;;  %v356_v62 = vadd.f32 %v764_v58, %v238_v50  ;;  %v337_v63 = vpop.f32.mrb[7].mxu1 }
 0x1d5   :  { %v591_v1 = vmul.f32 %v801_v51, %v583_v61  ;;  %v586_v5 = vld [vmem:[#allocation2 + $0x18] sm:$0xff]  ;;  %361 = vst.msk [vmem:[#allocation2 + $0x20] sm:$0xff] %vm108_vm0, %v353_v57  ;;  %v354_v14 = vadd.f32 %v337_v63, %v236_v54 }
 0x1d6   :  { %v601_v26 = vadd.f32 %v593_v59, %v529_v55  ;;  %v594_v33 = vmul.f32 %v803_v0, %v586_v5  ;;  %v584_v34 = vld [vmem:[#allocation2 + $0x8] sm:$0xff]  ;;  %364 = vst.msk [vmem:[#allocation2 + $0x38] sm:$0xff] %vm108_vm0, %v356_v62 }
 0x1d7   :  { %v599_v35 = vadd.f32 %v591_v1, %v527_v60  ;;  %v592_v36 = vmul.f32 %v805_v25, %v584_v34  ;;  %362 = vst.msk [vmem:[#allocation2 + $0x28] sm:$0xff] %vm108_vm0, %v354_v14 }
 0x1d8   :  { %609 = vst.msk [vmem:[%s1100_s8 + $0x10] sm:$0xff] %vm108_vm0, %v601_v26  ;;  %v602_v2 = vadd.f32 %v594_v33, %v530_v4 }
 0x1d9   :  { %607 = vst.msk [vmem:[%s1100_s8] sm:$0xff] %vm108_vm0, %v599_v35  ;;  %v600_v3 = vadd.f32 %v592_v36, %v528_v13 }
 0x1da   :  { %610 = vst.msk [vmem:[%s1100_s8 + $0x18] sm:$0xff] %vm108_vm0, %v602_v2 }
 0x1db   :  { %608 = vst.msk [vmem:[%s1100_s8 + $0x8] sm:$0xff] %vm108_vm0, %v600_v3  ;;  %v589_v9 = vld [vmem:[#allocation2 + $0x30] sm:$0xff] }
 0x1dc   :  { %v597_v24 = vmul.f32 %v807_v6, %v589_v9  ;;  %v587_v15 = vld [vmem:[#allocation2 + $0x20] sm:$0xff] }
 0x1dd   :  { %v595_v16 = vmul.f32 %v809_v7, %v587_v15  ;;  %v590_v11 = vld [vmem:[#allocation2 + $0x38] sm:$0xff] }
 0x1de   :  { %v605_v22 = vadd.f32 %v597_v24, %v533_v8  ;;  %v598_v38 = vmul.f32 %v811_v10, %v590_v11  ;;  %v588_v17 = vld [vmem:[#allocation2 + $0x28] sm:$0xff] }
 0x1df   :  { %v603_v23 = vadd.f32 %v595_v16, %v531_v37  ;;  %v596_v27 = vmul.f32 %v813_v21, %v588_v17 }
 0x1e0   :  { %613 = vst.msk [vmem:[%s1100_s8 + $0x30] sm:$0xff] %vm108_vm0, %v605_v22  ;;  %v606_v28 = vadd.f32 %v598_v38, %v534_v20 }
 0x1e1   :  { %611 = vst.msk [vmem:[%s1100_s8 + $0x20] sm:$0xff] %vm108_vm0, %v603_v23  ;;  %v604_v39 = vadd.f32 %v596_v27, %v532_v12 }
 0x1e2   :  { %614 = vst.msk [vmem:[%s1100_s8 + $0x38] sm:$0xff] %vm108_vm0, %v606_v28 }
 0x1e3   :  { %612 = vst.msk [vmem:[%s1100_s8 + $0x28] sm:$0xff] %vm108_vm0, %v604_v39 }

</bundles_post_ra>
